<compile_context>
chip_gen: v7x
topology: tpu7x:2x2x1
jax: 0.10.0
libtpu: 0.0.40
codegen_flags: <defaults>
</compile_context>

<pallas_src>
import jax
import jax.numpy as jnp
from jax import lax
from jax.experimental import pallas as pl
from jax.experimental.pallas import tpu as pltpu

_VMEM = pl.BlockSpec(memory_space=pltpu.MemorySpace.VMEM)


def _elu(x):
    return jnp.where(x > 0, x, jnp.exp(jnp.minimum(x, 0.0)) - 1.0)


def _gat_scores(h, att_src, att_dst):
    """leaky_relu(a_dst.h_i + a_src.h_j) — shared by the positive and negative graphs."""
    e_dst = jnp.sum(h * att_dst, axis=-1, keepdims=True)                     # (N, 1), VPU reduce
    # a_src . h_j laid out along lanes via a contracting dot (no (N, D) transpose).
    e_src = lax.dot_general(att_src, h, (((1,), (1,)), ((), ())),
                            preferred_element_type=jnp.float32)              # (1, N)
    z = e_dst + e_src                                                        # z[i, j]
    return jnp.where(z > 0, z, 0.2 * z)                                      # leaky_relu(0.2)


def _masked_softmax(z, adj):
    """row softmax of z over columns where adj[i, j] = 1 (rows with no edges -> all zeros)."""
    mask = adj > 0.0
    zm = jnp.where(mask, z, -1e30)
    m = jnp.max(zm, axis=-1, keepdims=True)
    pexp = jnp.where(mask, jnp.exp(zm - m), 0.0)
    denom = jnp.sum(pexp, axis=-1, keepdims=True)
    return pexp * pl.reciprocal(jnp.maximum(denom, 1e-30), approx=True)


def _csl_mean(adj, h):
    """scatter_mean(h[edge[1]], edge[0]) as a row-normalized dense matmul."""
    agg = jnp.dot(adj, h, preferred_element_type=jnp.float32)
    deg = jnp.sum(adj, axis=-1, keepdims=True)
    return agg * pl.reciprocal(jnp.maximum(deg, 1.0), approx=True)


def _fused_forward_kernel(
        f1_ref, f2_ref,
        adj1_gat_ref, adj2_gat_ref, adj_csl_gat_ref, adj1_ref, adj2_ref,
        w1_m1_ref, asrc_m1_ref, adst_m1_ref, w2_m1_ref,
        w1_m2_ref, asrc_m2_ref, adst_m2_ref, w2_m2_ref,
        w_omega_ref, u_omega_ref,
        dec_w1_ref, dec_b1_ref, dec_w2_ref, dec_b2_ref,
        o_ref):
    f1 = f1_ref[...]
    f2 = f2_ref[...]
    n = f1.shape[0]
    adj_csl_gat = adj_csl_gat_ref[...]

    # ---- layer-1 projections (shared by positive and edge_CSL negative branches) ------------
    h1p_m1 = jnp.dot(f1, w1_m1_ref[...], preferred_element_type=jnp.float32)
    h1p_m2 = jnp.dot(f2, w1_m2_ref[...], preferred_element_type=jnp.float32)

    # ---- GAT scores computed once per modality, masked twice (positive graph / CSL graph) ---
    z_m1 = _gat_scores(h1p_m1, asrc_m1_ref[...], adst_m1_ref[...])
    z_m2 = _gat_scores(h1p_m2, asrc_m2_ref[...], adst_m2_ref[...])

    attn_m1 = jnp.concatenate(
        [_masked_softmax(z_m1, adj1_gat_ref[...]), _masked_softmax(z_m1, adj_csl_gat)], axis=0)
    attn_m2 = jnp.concatenate(
        [_masked_softmax(z_m2, adj2_gat_ref[...]), _masked_softmax(z_m2, adj_csl_gat)], axis=0)

    # ---- row-stacked aggregation + ELU + layer-2 projection (attention=False -> plain W) ----
    h1_m1_cat = _elu(jnp.dot(attn_m1, h1p_m1, preferred_element_type=jnp.float32))  # (2N, hid1)
    h1_m2_cat = _elu(jnp.dot(attn_m2, h1p_m2, preferred_element_type=jnp.float32))  # (2N, hid2)
    h2_m1_cat = jnp.dot(h1_m1_cat, w2_m1_ref[...], preferred_element_type=jnp.float32)
    h2_m2_cat = jnp.dot(h1_m2_cat, w2_m2_ref[...], preferred_element_type=jnp.float32)

    h2_m1 = h2_m1_cat[:n, :]
    h2_m1_neg = h2_m1_cat[n:, :]
    h2_m2 = h2_m2_cat[:n, :]
    h2_m2_neg = h2_m2_cat[n:, :]

    # ---- cross-modal AttentionLayer (row-stack both modalities; softmax over the 2) ----------
    h2_pos_cat = jnp.concatenate([h2_m1, h2_m2], axis=0)                      # (2N, out)
    v = jnp.tanh(jnp.dot(h2_pos_cat, w_omega_ref[...], preferred_element_type=jnp.float32))
    s = jnp.dot(v, u_omega_ref[...], preferred_element_type=jnp.float32) + 1e-6    # (2N, 1)
    s1 = s[:n, :]
    s2 = s[n:, :]
    m12 = jnp.maximum(s1, s2)
    e1 = jnp.exp(s1 - m12)
    e2 = jnp.exp(s2 - m12)
    inv = pl.reciprocal(e1 + e2, approx=True)
    a1 = e1 * inv
    a2 = e2 * inv
    emb = a1 * h2_m1 + a2 * h2_m2                                             # emb^T @ alpha

    # ---- both decoders fused: one lane-dense matmul pair -------------------------------------
    d1 = _elu(jnp.dot(emb, dec_w1_ref[...], preferred_element_type=jnp.float32) + dec_b1_ref[...])
    rec_cat = jnp.dot(d1, dec_w2_ref[...], preferred_element_type=jnp.float32) + dec_b2_ref[...]

    # ---- CSL positives (the torch module's discarded CSL negatives are not computed) ---------
    h_m1_pos = _csl_mean(adj1_ref[...], h2_m1)
    h_m2_pos = _csl_mean(adj2_ref[...], h2_m2)

    # ---- one lane-dense output slab -----------------------------------------------------------
    pieces = [h2_m1, h2_m2, h_m1_pos, h_m2_pos, h2_m1_neg, h2_m2_neg, emb, rec_cat, a1, a2]
    total = sum(x.shape[1] for x in pieces)
    pad = o_ref.shape[1] - total
    if pad > 0:
        pieces.append(jnp.zeros((n, pad), jnp.float32))
    o_ref[...] = jnp.concatenate(pieces, axis=-1)


def _dense_masks(edge_index, n):
    """dense[r, c] = 1 iff (edge[0]=r, edge[1]=c); transposed mask built directly (no .T)."""
    src = edge_index[0]
    dst = edge_index[1]
    a = jnp.zeros((n, n), jnp.float32).at[src, dst].set(1.0)
    a_t = jnp.zeros((n, n), jnp.float32).at[dst, src].set(1.0)
    return a, a_t


def spatial_mosi_att_forward(p, features_1, features_2,
                             edge_index_1, edge_index_2, edge_CSL):
    n = features_1.shape[0]
    f32 = jnp.float32

    # adjacency masks: GAT message passing uses A[dst, src]; CSL uses A[scatter, gather]
    adj1, adj1_gat = _dense_masks(edge_index_1, n)
    adj2, adj2_gat = _dense_masks(edge_index_2, n)
    _, adj_csl_gat = _dense_masks(edge_CSL, n)       # only the transposed mask is needed

    out1 = p['w2_m1'].shape[1]
    out2 = p['w2_m2'].shape[1]
    hid1 = p['dec1_m1_w'].shape[1]
    hid2 = p['dec1_m2_w'].shape[1]
    in1 = p['dec2_m1_w'].shape[1]
    in2 = p['dec2_m2_w'].shape[1]

    # fuse the two decoders: concat stage-1 weights, block-diagonal stage-2 weights
    dec_w1 = jnp.concatenate([p['dec1_m1_w'], p['dec1_m2_w']], axis=1)       # (out, hid1+hid2)
    dec_b1 = jnp.concatenate([p['dec1_m1_b'], p['dec1_m2_b']], axis=1)
    dec_w2 = jnp.zeros((hid1 + hid2, in1 + in2), f32)
    dec_w2 = dec_w2.at[:hid1, :in1].set(p['dec2_m1_w'])
    dec_w2 = dec_w2.at[hid1:, in1:].set(p['dec2_m2_w'])
    dec_b2 = jnp.concatenate([p['dec2_m1_b'], p['dec2_m2_b']], axis=1)

    sizes = [out1, out2, out1, out2, out1, out2, out1, in1 + in2, 1, 1]
    total = sum(sizes)
    slab_w = ((total + 127) // 128) * 128            # lane-dense output width

    args = (features_1, features_2,
            adj1_gat, adj2_gat, adj_csl_gat, adj1, adj2,
            p['w1_m1'], p['asrc1_m1'], p['adst1_m1'], p['w2_m1'],
            p['w1_m2'], p['asrc1_m2'], p['adst1_m2'], p['w2_m2'],
            p['w_omega'], p['u_omega'],
            dec_w1, dec_b1, dec_w2, dec_b2)

    io_bytes = sum(int(a.size) * a.dtype.itemsize for a in args) + n * slab_w * 4
    vmem_limit = int(min(64 * 1024 * 1024, max(16 * 1024 * 1024, 8 * io_bytes)))

    slab = pl.pallas_call(
        _fused_forward_kernel,
        in_specs=[_VMEM] * len(args),
        out_specs=_VMEM,
        out_shape=jax.ShapeDtypeStruct((n, slab_w), f32),
        compiler_params=pltpu.CompilerParams(vmem_limit_bytes=vmem_limit),
    )(*args)

    offs = [0]
    for s in sizes:
        offs.append(offs[-1] + s)
    h2_mod1 = slab[:, offs[0]:offs[1]]
    h2_mod2 = slab[:, offs[1]:offs[2]]
    h_mod1_pos = slab[:, offs[2]:offs[3]]
    h_mod2_pos = slab[:, offs[3]:offs[4]]
    h2_mod1_neg = slab[:, offs[4]:offs[5]]
    h2_mod2_neg = slab[:, offs[5]:offs[6]]
    emb = slab[:, offs[6]:offs[7]]
    rec_cat = slab[:, offs[7]:offs[8]]
    rec_mod1 = rec_cat[:, :in1]
    rec_mod2 = rec_cat[:, in1:]
    atts = slab[:, offs[8]:offs[10]]

    return (h2_mod1, h2_mod2, h_mod1_pos, h_mod2_pos,
            h2_mod1_neg, h2_mod2_neg, emb, rec_mod1, rec_mod2, atts)


# --------------------------------- parameters (deterministic) --------------------------------
def _xavier(key, shape):
    fan_in, fan_out = shape[0], shape[-1]
    bound = (6.0 / (fan_in + fan_out)) ** 0.5
    return jax.random.uniform(key, shape, jnp.float32, -bound, bound)


def _linear_init(key, in_f, out_f):
    # torch.nn.Linear default init; weights stored transposed (in, out), bias as (1, out).
    kw, kb = jax.random.split(key)
    bound = 1.0 / (in_f ** 0.5)
    w = jax.random.uniform(kw, (in_f, out_f), jnp.float32, -bound, bound)
    b = jax.random.uniform(kb, (1, out_f), jnp.float32, -bound, bound)
    return w, b


def init_params(key, hidden_dims_1, hidden_dims_2):
    in1, hid1, out1 = hidden_dims_1
    in2, hid2, out2 = hidden_dims_2
    assert out1 == out2, "AttentionLayer requires out_dim_1 == out_dim_2"
    keys = jax.random.split(key, 14)
    p = {}
    # GATConv params: W (in, out), att_src / att_dst (1, out) with heads=1
    p['w1_m1'] = _xavier(keys[0], (in1, hid1))
    p['asrc1_m1'] = _xavier(keys[1], (1, hid1))
    p['adst1_m1'] = _xavier(keys[2], (1, hid1))
    p['w2_m1'] = _xavier(keys[3], (hid1, out1))
    p['w1_m2'] = _xavier(keys[4], (in2, hid2))
    p['asrc1_m2'] = _xavier(keys[5], (1, hid2))
    p['adst1_m2'] = _xavier(keys[6], (1, hid2))
    p['w2_m2'] = _xavier(keys[7], (hid2, out2))
    # AttentionLayer(out1, out2)
    p['w_omega'] = _xavier(keys[8], (out1, out2))
    p['u_omega'] = _xavier(keys[9], (out2, 1))
    # decoders
    p['dec1_m1_w'], p['dec1_m1_b'] = _linear_init(keys[10], out1, hid1)
    p['dec2_m1_w'], p['dec2_m1_b'] = _linear_init(keys[11], hid1, in1)
    p['dec1_m2_w'], p['dec1_m2_b'] = _linear_init(keys[12], out2, hid2)
    p['dec2_m2_w'], p['dec2_m2_b'] = _linear_init(keys[13], hid2, in2)
    return p


if __name__ == "__main__":
    key = jax.random.PRNGKey(0)
    N = 16                          # multiple of 8 -> row-stacked splits are sublane aligned
    hidden_dims_1 = (32, 16, 8)     # [in_dim_1, num_hidden_1, out_dim_1]
    hidden_dims_2 = (24, 16, 8)     # [in_dim_2, num_hidden_2, out_dim_2]

    k_par, k_f1, k_f2 = jax.random.split(key, 3)
    params = init_params(k_par, hidden_dims_1, hidden_dims_2)

    features_1 = jax.random.normal(k_f1, (N, hidden_dims_1[0]), jnp.float32)
    features_2 = jax.random.normal(k_f2, (N, hidden_dims_2[0]), jnp.float32)

    idx = jnp.arange(N)
    edge_index_1 = jnp.stack([jnp.concatenate([idx, idx]),
                              jnp.concatenate([(idx + 1) % N, (idx + 2) % N])])   # (2, 32)
    edge_index_2 = jnp.stack([jnp.concatenate([idx, idx]),
                              jnp.concatenate([(idx + 3) % N, (idx + 5) % N])])   # (2, 32)
    edge_CSL = jnp.stack([idx, (idx + 7) % N])                                    # (2, 16)

    fwd = jax.jit(spatial_mosi_att_forward)
    outs = fwd(params, features_1, features_2, edge_index_1, edge_index_2, edge_CSL)
    outs = jax.block_until_ready(outs)

    assert outs[0].shape == (N, hidden_dims_1[2])   # h2_mod1
    assert outs[1].shape == (N, hidden_dims_2[2])   # h2_mod2
    assert outs[2].shape == (N, hidden_dims_1[2])   # h_mod1_pos
    assert outs[3].shape == (N, hidden_dims_2[2])   # h_mod2_pos
    assert outs[4].shape == (N, hidden_dims_1[2])   # h2_mod1_neg
    assert outs[5].shape == (N, hidden_dims_2[2])   # h2_mod2_neg
    assert outs[6].shape == (N, hidden_dims_1[2])   # emb
    assert outs[7].shape == (N, hidden_dims_1[0])   # rec_mod1
    assert outs[8].shape == (N, hidden_dims_2[0])   # rec_mod2
    assert outs[9].shape == (N, 2)                  # atts
    assert all(bool(jnp.all(jnp.isfinite(o))) for o in outs)
    print("KERNEL_OK")
</pallas_src>

<mosaic_0001>
module attributes {stable_mosaic.version = 11 : i64} {
  func.func @_fused_forward_kernel(%arg0: memref<16x32xf32, #tpu.memory_space<vmem>>, %arg1: memref<16x24xf32, #tpu.memory_space<vmem>>, %arg2: memref<16x16xf32, #tpu.memory_space<vmem>>, %arg3: memref<16x16xf32, #tpu.memory_space<vmem>>, %arg4: memref<16x16xf32, #tpu.memory_space<vmem>>, %arg5: memref<16x16xf32, #tpu.memory_space<vmem>>, %arg6: memref<16x16xf32, #tpu.memory_space<vmem>>, %arg7: memref<32x16xf32, #tpu.memory_space<vmem>>, %arg8: memref<1x16xf32, #tpu.memory_space<vmem>>, %arg9: memref<1x16xf32, #tpu.memory_space<vmem>>, %arg10: memref<16x8xf32, #tpu.memory_space<vmem>>, %arg11: memref<24x16xf32, #tpu.memory_space<vmem>>, %arg12: memref<1x16xf32, #tpu.memory_space<vmem>>, %arg13: memref<1x16xf32, #tpu.memory_space<vmem>>, %arg14: memref<16x8xf32, #tpu.memory_space<vmem>>, %arg15: memref<8x8xf32, #tpu.memory_space<vmem>>, %arg16: memref<8x1xf32, #tpu.memory_space<vmem>>, %arg17: memref<8x32xf32, #tpu.memory_space<vmem>>, %arg18: memref<1x32xf32, #tpu.memory_space<vmem>>, %arg19: memref<32x56xf32, #tpu.memory_space<vmem>>, %arg20: memref<1x56xf32, #tpu.memory_space<vmem>>, %arg21: memref<16x128xf32, #tpu.memory_space<vmem>>) attributes {dimension_semantics = [], scalar_prefetch = 0 : i64, scratch_operands = 0 : i64, tpu.core_type = #tpu.core_type<tc>} {
    %c0 = arith.constant 0 : index
    %c0_0 = arith.constant 0 : index
    %0 = vector.load %arg0[%c0, %c0_0] : memref<16x32xf32, #tpu.memory_space<vmem>>, vector<16x32xf32>
    %c0_1 = arith.constant 0 : index
    %c0_2 = arith.constant 0 : index
    %1 = vector.load %arg1[%c0_1, %c0_2] : memref<16x24xf32, #tpu.memory_space<vmem>>, vector<16x24xf32>
    %c0_3 = arith.constant 0 : index
    %c0_4 = arith.constant 0 : index
    %2 = vector.load %arg4[%c0_3, %c0_4] : memref<16x16xf32, #tpu.memory_space<vmem>>, vector<16x16xf32>
    %c0_5 = arith.constant 0 : index
    %c0_6 = arith.constant 0 : index
    %3 = vector.load %arg7[%c0_5, %c0_6] : memref<32x16xf32, #tpu.memory_space<vmem>>, vector<32x16xf32>
    %cst = arith.constant dense<0.000000e+00> : vector<16x16xf32>
    %4 = tpu.matmul %0, %3, %cst {dimension_numbers = #tpu.dot_dimension_numbers<[1], [0], [0], [1], [0, 0, 1, 1], [], []>} : vector<16x32xf32>, vector<32x16xf32>, vector<16x16xf32> -> vector<16x16xf32>
    %c0_7 = arith.constant 0 : index
    %c0_8 = arith.constant 0 : index
    %5 = vector.load %arg11[%c0_7, %c0_8] : memref<24x16xf32, #tpu.memory_space<vmem>>, vector<24x16xf32>
    %cst_9 = arith.constant dense<0.000000e+00> : vector<16x16xf32>
    %6 = tpu.matmul %1, %5, %cst_9 {dimension_numbers = #tpu.dot_dimension_numbers<[1], [0], [0], [1], [0, 0, 1, 1], [], []>} : vector<16x24xf32>, vector<24x16xf32>, vector<16x16xf32> -> vector<16x16xf32>
    %c0_10 = arith.constant 0 : index
    %c0_11 = arith.constant 0 : index
    %7 = vector.load %arg8[%c0_10, %c0_11] : memref<1x16xf32, #tpu.memory_space<vmem>>, vector<1x16xf32>
    %c0_12 = arith.constant 0 : index
    %c0_13 = arith.constant 0 : index
    %8 = vector.load %arg9[%c0_12, %c0_13] : memref<1x16xf32, #tpu.memory_space<vmem>>, vector<1x16xf32>
    %9 = vector.broadcast %8 : vector<1x16xf32> to vector<16x16xf32>
    %10 = arith.mulf %4, %9 : vector<16x16xf32>
    %cst_14 = arith.constant dense<0.000000e+00> : vector<16xf32>
    %11 = vector.multi_reduction <add>, %10, %cst_14 [1] : vector<16x16xf32> to vector<16xf32>
    %12 = vector.shape_cast %11 : vector<16xf32> to vector<16x1xf32>
    %cst_15 = arith.constant dense<0.000000e+00> : vector<1x16xf32>
    %13 = tpu.matmul %7, %4, %cst_15 {dimension_numbers = #tpu.dot_dimension_numbers<[1], [1], [0], [0], [0, 0, 1, 0], [], []>} : vector<1x16xf32>, vector<16x16xf32>, vector<1x16xf32> -> vector<1x16xf32>
    %14 = vector.broadcast %12 : vector<16x1xf32> to vector<16x16xf32>
    %15 = vector.broadcast %13 : vector<1x16xf32> to vector<16x16xf32>
    %16 = arith.addf %14, %15 : vector<16x16xf32>
    %cst_16 = arith.constant 0.000000e+00 : f32
    %17 = vector.broadcast %cst_16 : f32 to vector<16x16xf32>
    %18 = arith.cmpf ogt, %16, %17 : vector<16x16xf32>
    %cst_17 = arith.constant 2.000000e-01 : f32
    %19 = vector.broadcast %cst_17 : f32 to vector<16x16xf32>
    %20 = arith.mulf %19, %16 : vector<16x16xf32>
    %21 = arith.select %18, %16, %20 : vector<16x16xi1>, vector<16x16xf32>
    %c0_18 = arith.constant 0 : index
    %c0_19 = arith.constant 0 : index
    %22 = vector.load %arg12[%c0_18, %c0_19] : memref<1x16xf32, #tpu.memory_space<vmem>>, vector<1x16xf32>
    %c0_20 = arith.constant 0 : index
    %c0_21 = arith.constant 0 : index
    %23 = vector.load %arg13[%c0_20, %c0_21] : memref<1x16xf32, #tpu.memory_space<vmem>>, vector<1x16xf32>
    %24 = vector.broadcast %23 : vector<1x16xf32> to vector<16x16xf32>
    %25 = arith.mulf %6, %24 : vector<16x16xf32>
    %cst_22 = arith.constant dense<0.000000e+00> : vector<16xf32>
    %26 = vector.multi_reduction <add>, %25, %cst_22 [1] : vector<16x16xf32> to vector<16xf32>
    %27 = vector.shape_cast %26 : vector<16xf32> to vector<16x1xf32>
    %cst_23 = arith.constant dense<0.000000e+00> : vector<1x16xf32>
    %28 = tpu.matmul %22, %6, %cst_23 {dimension_numbers = #tpu.dot_dimension_numbers<[1], [1], [0], [0], [0, 0, 1, 0], [], []>} : vector<1x16xf32>, vector<16x16xf32>, vector<1x16xf32> -> vector<1x16xf32>
    %29 = vector.broadcast %27 : vector<16x1xf32> to vector<16x16xf32>
    %30 = vector.broadcast %28 : vector<1x16xf32> to vector<16x16xf32>
    %31 = arith.addf %29, %30 : vector<16x16xf32>
    %cst_24 = arith.constant 0.000000e+00 : f32
    %32 = vector.broadcast %cst_24 : f32 to vector<16x16xf32>
    %33 = arith.cmpf ogt, %31, %32 : vector<16x16xf32>
    %cst_25 = arith.constant 2.000000e-01 : f32
    %34 = vector.broadcast %cst_25 : f32 to vector<16x16xf32>
    %35 = arith.mulf %34, %31 : vector<16x16xf32>
    %36 = arith.select %33, %31, %35 : vector<16x16xi1>, vector<16x16xf32>
    %c0_26 = arith.constant 0 : index
    %c0_27 = arith.constant 0 : index
    %37 = vector.load %arg2[%c0_26, %c0_27] : memref<16x16xf32, #tpu.memory_space<vmem>>, vector<16x16xf32>
    %cst_28 = arith.constant 0.000000e+00 : f32
    %38 = vector.broadcast %cst_28 : f32 to vector<16x16xf32>
    %39 = arith.cmpf ogt, %37, %38 : vector<16x16xf32>
    %cst_29 = arith.constant -1.000000e+30 : f32
    %40 = vector.broadcast %cst_29 : f32 to vector<16x16xf32>
    %41 = arith.select %39, %21, %40 : vector<16x16xi1>, vector<16x16xf32>
    %cst_30 = arith.constant dense<0xFF800000> : vector<16xf32>
    %42 = vector.multi_reduction <maximumf>, %41, %cst_30 [1] : vector<16x16xf32> to vector<16xf32>
    %43 = vector.shape_cast %42 : vector<16xf32> to vector<16x1xf32>
    %44 = vector.broadcast %43 : vector<16x1xf32> to vector<16x16xf32>
    %45 = arith.subf %41, %44 : vector<16x16xf32>
    %46 = math.exp %45 : vector<16x16xf32>
    %cst_31 = arith.constant 0.000000e+00 : f32
    %47 = vector.broadcast %cst_31 : f32 to vector<16x16xf32>
    %48 = arith.select %39, %46, %47 : vector<16x16xi1>, vector<16x16xf32>
    %cst_32 = arith.constant dense<0.000000e+00> : vector<16xf32>
    %49 = vector.multi_reduction <add>, %48, %cst_32 [1] : vector<16x16xf32> to vector<16xf32>
    %50 = vector.shape_cast %49 : vector<16xf32> to vector<16x1xf32>
    %cst_33 = arith.constant 1.000000e-30 : f32
    %51 = vector.broadcast %cst_33 : f32 to vector<16x1xf32>
    %52 = arith.maximumf %50, %51 : vector<16x1xf32>
    %53 = tpu.reciprocal %52 {approx = true} : vector<16x1xf32> -> vector<16x1xf32>
    %54 = vector.broadcast %53 : vector<16x1xf32> to vector<16x16xf32>
    %55 = arith.mulf %48, %54 : vector<16x16xf32>
    %cst_34 = arith.constant 0.000000e+00 : f32
    %56 = vector.broadcast %cst_34 : f32 to vector<16x16xf32>
    %57 = arith.cmpf ogt, %2, %56 : vector<16x16xf32>
    %cst_35 = arith.constant -1.000000e+30 : f32
    %58 = vector.broadcast %cst_35 : f32 to vector<16x16xf32>
    %59 = arith.select %57, %21, %58 : vector<16x16xi1>, vector<16x16xf32>
    %cst_36 = arith.constant dense<0xFF800000> : vector<16xf32>
    %60 = vector.multi_reduction <maximumf>, %59, %cst_36 [1] : vector<16x16xf32> to vector<16xf32>
    %61 = vector.shape_cast %60 : vector<16xf32> to vector<16x1xf32>
    %62 = vector.broadcast %61 : vector<16x1xf32> to vector<16x16xf32>
    %63 = arith.subf %59, %62 : vector<16x16xf32>
    %64 = math.exp %63 : vector<16x16xf32>
    %cst_37 = arith.constant 0.000000e+00 : f32
    %65 = vector.broadcast %cst_37 : f32 to vector<16x16xf32>
    %66 = arith.select %57, %64, %65 : vector<16x16xi1>, vector<16x16xf32>
    %cst_38 = arith.constant dense<0.000000e+00> : vector<16xf32>
    %67 = vector.multi_reduction <add>, %66, %cst_38 [1] : vector<16x16xf32> to vector<16xf32>
    %68 = vector.shape_cast %67 : vector<16xf32> to vector<16x1xf32>
    %cst_39 = arith.constant 1.000000e-30 : f32
    %69 = vector.broadcast %cst_39 : f32 to vector<16x1xf32>
    %70 = arith.maximumf %68, %69 : vector<16x1xf32>
    %71 = tpu.reciprocal %70 {approx = true} : vector<16x1xf32> -> vector<16x1xf32>
    %72 = vector.broadcast %71 : vector<16x1xf32> to vector<16x16xf32>
    %73 = arith.mulf %66, %72 : vector<16x16xf32>
    %74 = tpu.concatenate %55, %73 in 0 : vector<16x16xf32>, vector<16x16xf32> -> vector<32x16xf32>
    %c0_40 = arith.constant 0 : index
    %c0_41 = arith.constant 0 : index
    %75 = vector.load %arg3[%c0_40, %c0_41] : memref<16x16xf32, #tpu.memory_space<vmem>>, vector<16x16xf32>
    %cst_42 = arith.constant 0.000000e+00 : f32
    %76 = vector.broadcast %cst_42 : f32 to vector<16x16xf32>
    %77 = arith.cmpf ogt, %75, %76 : vector<16x16xf32>
    %cst_43 = arith.constant -1.000000e+30 : f32
    %78 = vector.broadcast %cst_43 : f32 to vector<16x16xf32>
    %79 = arith.select %77, %36, %78 : vector<16x16xi1>, vector<16x16xf32>
    %cst_44 = arith.constant dense<0xFF800000> : vector<16xf32>
    %80 = vector.multi_reduction <maximumf>, %79, %cst_44 [1] : vector<16x16xf32> to vector<16xf32>
    %81 = vector.shape_cast %80 : vector<16xf32> to vector<16x1xf32>
    %82 = vector.broadcast %81 : vector<16x1xf32> to vector<16x16xf32>
    %83 = arith.subf %79, %82 : vector<16x16xf32>
    %84 = math.exp %83 : vector<16x16xf32>
    %cst_45 = arith.constant 0.000000e+00 : f32
    %85 = vector.broadcast %cst_45 : f32 to vector<16x16xf32>
    %86 = arith.select %77, %84, %85 : vector<16x16xi1>, vector<16x16xf32>
    %cst_46 = arith.constant dense<0.000000e+00> : vector<16xf32>
    %87 = vector.multi_reduction <add>, %86, %cst_46 [1] : vector<16x16xf32> to vector<16xf32>
    %88 = vector.shape_cast %87 : vector<16xf32> to vector<16x1xf32>
    %cst_47 = arith.constant 1.000000e-30 : f32
    %89 = vector.broadcast %cst_47 : f32 to vector<16x1xf32>
    %90 = arith.maximumf %88, %89 : vector<16x1xf32>
    %91 = tpu.reciprocal %90 {approx = true} : vector<16x1xf32> -> vector<16x1xf32>
    %92 = vector.broadcast %91 : vector<16x1xf32> to vector<16x16xf32>
    %93 = arith.mulf %86, %92 : vector<16x16xf32>
    %cst_48 = arith.constant 0.000000e+00 : f32
    %94 = vector.broadcast %cst_48 : f32 to vector<16x16xf32>
    %95 = arith.cmpf ogt, %2, %94 : vector<16x16xf32>
    %cst_49 = arith.constant -1.000000e+30 : f32
    %96 = vector.broadcast %cst_49 : f32 to vector<16x16xf32>
    %97 = arith.select %95, %36, %96 : vector<16x16xi1>, vector<16x16xf32>
    %cst_50 = arith.constant dense<0xFF800000> : vector<16xf32>
    %98 = vector.multi_reduction <maximumf>, %97, %cst_50 [1] : vector<16x16xf32> to vector<16xf32>
    %99 = vector.shape_cast %98 : vector<16xf32> to vector<16x1xf32>
    %100 = vector.broadcast %99 : vector<16x1xf32> to vector<16x16xf32>
    %101 = arith.subf %97, %100 : vector<16x16xf32>
    %102 = math.exp %101 : vector<16x16xf32>
    %cst_51 = arith.constant 0.000000e+00 : f32
    %103 = vector.broadcast %cst_51 : f32 to vector<16x16xf32>
    %104 = arith.select %95, %102, %103 : vector<16x16xi1>, vector<16x16xf32>
    %cst_52 = arith.constant dense<0.000000e+00> : vector<16xf32>
    %105 = vector.multi_reduction <add>, %104, %cst_52 [1] : vector<16x16xf32> to vector<16xf32>
    %106 = vector.shape_cast %105 : vector<16xf32> to vector<16x1xf32>
    %cst_53 = arith.constant 1.000000e-30 : f32
    %107 = vector.broadcast %cst_53 : f32 to vector<16x1xf32>
    %108 = arith.maximumf %106, %107 : vector<16x1xf32>
    %109 = tpu.reciprocal %108 {approx = true} : vector<16x1xf32> -> vector<16x1xf32>
    %110 = vector.broadcast %109 : vector<16x1xf32> to vector<16x16xf32>
    %111 = arith.mulf %104, %110 : vector<16x16xf32>
    %112 = tpu.concatenate %93, %111 in 0 : vector<16x16xf32>, vector<16x16xf32> -> vector<32x16xf32>
    %cst_54 = arith.constant dense<0.000000e+00> : vector<32x16xf32>
    %113 = tpu.matmul %74, %4, %cst_54 {dimension_numbers = #tpu.dot_dimension_numbers<[1], [0], [0], [1], [0, 0, 1, 1], [], []>} : vector<32x16xf32>, vector<16x16xf32>, vector<32x16xf32> -> vector<32x16xf32>
    %cst_55 = arith.constant 0.000000e+00 : f32
    %114 = vector.broadcast %cst_55 : f32 to vector<32x16xf32>
    %115 = arith.cmpf ogt, %113, %114 : vector<32x16xf32>
    %cst_56 = arith.constant 0.000000e+00 : f32
    %116 = vector.broadcast %cst_56 : f32 to vector<32x16xf32>
    %117 = arith.minimumf %113, %116 : vector<32x16xf32>
    %118 = math.exp %117 : vector<32x16xf32>
    %cst_57 = arith.constant 1.000000e+00 : f32
    %119 = vector.broadcast %cst_57 : f32 to vector<32x16xf32>
    %120 = arith.subf %118, %119 : vector<32x16xf32>
    %121 = arith.select %115, %113, %120 : vector<32x16xi1>, vector<32x16xf32>
    %cst_58 = arith.constant dense<0.000000e+00> : vector<32x16xf32>
    %122 = tpu.matmul %112, %6, %cst_58 {dimension_numbers = #tpu.dot_dimension_numbers<[1], [0], [0], [1], [0, 0, 1, 1], [], []>} : vector<32x16xf32>, vector<16x16xf32>, vector<32x16xf32> -> vector<32x16xf32>
    %cst_59 = arith.constant 0.000000e+00 : f32
    %123 = vector.broadcast %cst_59 : f32 to vector<32x16xf32>
    %124 = arith.cmpf ogt, %122, %123 : vector<32x16xf32>
    %cst_60 = arith.constant 0.000000e+00 : f32
    %125 = vector.broadcast %cst_60 : f32 to vector<32x16xf32>
    %126 = arith.minimumf %122, %125 : vector<32x16xf32>
    %127 = math.exp %126 : vector<32x16xf32>
    %cst_61 = arith.constant 1.000000e+00 : f32
    %128 = vector.broadcast %cst_61 : f32 to vector<32x16xf32>
    %129 = arith.subf %127, %128 : vector<32x16xf32>
    %130 = arith.select %124, %122, %129 : vector<32x16xi1>, vector<32x16xf32>
    %c0_62 = arith.constant 0 : index
    %c0_63 = arith.constant 0 : index
    %131 = vector.load %arg10[%c0_62, %c0_63] : memref<16x8xf32, #tpu.memory_space<vmem>>, vector<16x8xf32>
    %cst_64 = arith.constant dense<0.000000e+00> : vector<32x8xf32>
    %132 = tpu.matmul %121, %131, %cst_64 {dimension_numbers = #tpu.dot_dimension_numbers<[1], [0], [0], [1], [0, 0, 1, 1], [], []>} : vector<32x16xf32>, vector<16x8xf32>, vector<32x8xf32> -> vector<32x8xf32>
    %c0_65 = arith.constant 0 : index
    %c0_66 = arith.constant 0 : index
    %133 = vector.load %arg14[%c0_65, %c0_66] : memref<16x8xf32, #tpu.memory_space<vmem>>, vector<16x8xf32>
    %cst_67 = arith.constant dense<0.000000e+00> : vector<32x8xf32>
    %134 = tpu.matmul %130, %133, %cst_67 {dimension_numbers = #tpu.dot_dimension_numbers<[1], [0], [0], [1], [0, 0, 1, 1], [], []>} : vector<32x16xf32>, vector<16x8xf32>, vector<32x8xf32> -> vector<32x8xf32>
    %135 = vector.extract_strided_slice %132 {offsets = [0, 0], sizes = [16, 8], strides = [1, 1]} : vector<32x8xf32> to vector<16x8xf32>
    %136 = vector.extract_strided_slice %132 {offsets = [16, 0], sizes = [16, 8], strides = [1, 1]} : vector<32x8xf32> to vector<16x8xf32>
    %137 = vector.extract_strided_slice %134 {offsets = [0, 0], sizes = [16, 8], strides = [1, 1]} : vector<32x8xf32> to vector<16x8xf32>
    %138 = vector.extract_strided_slice %134 {offsets = [16, 0], sizes = [16, 8], strides = [1, 1]} : vector<32x8xf32> to vector<16x8xf32>
    %139 = tpu.concatenate %135, %137 in 0 : vector<16x8xf32>, vector<16x8xf32> -> vector<32x8xf32>
    %c0_68 = arith.constant 0 : index
    %c0_69 = arith.constant 0 : index
    %140 = vector.load %arg15[%c0_68, %c0_69] : memref<8x8xf32, #tpu.memory_space<vmem>>, vector<8x8xf32>
    %cst_70 = arith.constant dense<0.000000e+00> : vector<32x8xf32>
    %141 = tpu.matmul %139, %140, %cst_70 {dimension_numbers = #tpu.dot_dimension_numbers<[1], [0], [0], [1], [0, 0, 1, 1], [], []>} : vector<32x8xf32>, vector<8x8xf32>, vector<32x8xf32> -> vector<32x8xf32>
    %142 = math.tanh %141 : vector<32x8xf32>
    %c0_71 = arith.constant 0 : index
    %c0_72 = arith.constant 0 : index
    %143 = vector.load %arg16[%c0_71, %c0_72] : memref<8x1xf32, #tpu.memory_space<vmem>>, vector<8x1xf32>
    %cst_73 = arith.constant dense<0.000000e+00> : vector<32x1xf32>
    %144 = tpu.matmul %142, %143, %cst_73 {dimension_numbers = #tpu.dot_dimension_numbers<[1], [0], [0], [1], [0, 0, 1, 1], [], []>} : vector<32x8xf32>, vector<8x1xf32>, vector<32x1xf32> -> vector<32x1xf32>
    %cst_74 = arith.constant 9.99999997E-7 : f32
    %145 = vector.broadcast %cst_74 : f32 to vector<32x1xf32>
    %146 = arith.addf %144, %145 : vector<32x1xf32>
    %147 = vector.extract_strided_slice %146 {offsets = [0, 0], sizes = [16, 1], strides = [1, 1]} : vector<32x1xf32> to vector<16x1xf32>
    %148 = vector.extract_strided_slice %146 {offsets = [16, 0], sizes = [16, 1], strides = [1, 1]} : vector<32x1xf32> to vector<16x1xf32>
    %149 = arith.maximumf %147, %148 : vector<16x1xf32>
    %150 = arith.subf %147, %149 : vector<16x1xf32>
    %151 = math.exp %150 : vector<16x1xf32>
    %152 = arith.subf %148, %149 : vector<16x1xf32>
    %153 = math.exp %152 : vector<16x1xf32>
    %154 = arith.addf %151, %153 : vector<16x1xf32>
    %155 = tpu.reciprocal %154 {approx = true} : vector<16x1xf32> -> vector<16x1xf32>
    %156 = arith.mulf %151, %155 : vector<16x1xf32>
    %157 = arith.mulf %153, %155 : vector<16x1xf32>
    %158 = vector.broadcast %156 : vector<16x1xf32> to vector<16x8xf32>
    %159 = arith.mulf %158, %135 : vector<16x8xf32>
    %160 = vector.broadcast %157 : vector<16x1xf32> to vector<16x8xf32>
    %161 = arith.mulf %160, %137 : vector<16x8xf32>
    %162 = arith.addf %159, %161 : vector<16x8xf32>
    %c0_75 = arith.constant 0 : index
    %c0_76 = arith.constant 0 : index
    %163 = vector.load %arg17[%c0_75, %c0_76] : memref<8x32xf32, #tpu.memory_space<vmem>>, vector<8x32xf32>
    %cst_77 = arith.constant dense<0.000000e+00> : vector<16x32xf32>
    %164 = tpu.matmul %162, %163, %cst_77 {dimension_numbers = #tpu.dot_dimension_numbers<[1], [0], [0], [1], [0, 0, 1, 1], [], []>} : vector<16x8xf32>, vector<8x32xf32>, vector<16x32xf32> -> vector<16x32xf32>
    %c0_78 = arith.constant 0 : index
    %c0_79 = arith.constant 0 : index
    %165 = vector.load %arg18[%c0_78, %c0_79] : memref<1x32xf32, #tpu.memory_space<vmem>>, vector<1x32xf32>
    %166 = vector.broadcast %165 : vector<1x32xf32> to vector<16x32xf32>
    %167 = arith.addf %164, %166 : vector<16x32xf32>
    %cst_80 = arith.constant 0.000000e+00 : f32
    %168 = vector.broadcast %cst_80 : f32 to vector<16x32xf32>
    %169 = arith.cmpf ogt, %167, %168 : vector<16x32xf32>
    %cst_81 = arith.constant 0.000000e+00 : f32
    %170 = vector.broadcast %cst_81 : f32 to vector<16x32xf32>
    %171 = arith.minimumf %167, %170 : vector<16x32xf32>
    %172 = math.exp %171 : vector<16x32xf32>
    %cst_82 = arith.constant 1.000000e+00 : f32
    %173 = vector.broadcast %cst_82 : f32 to vector<16x32xf32>
    %174 = arith.subf %172, %173 : vector<16x32xf32>
    %175 = arith.select %169, %167, %174 : vector<16x32xi1>, vector<16x32xf32>
    %c0_83 = arith.constant 0 : index
    %c0_84 = arith.constant 0 : index
    %176 = vector.load %arg19[%c0_83, %c0_84] : memref<32x56xf32, #tpu.memory_space<vmem>>, vector<32x56xf32>
    %cst_85 = arith.constant dense<0.000000e+00> : vector<16x56xf32>
    %177 = tpu.matmul %175, %176, %cst_85 {dimension_numbers = #tpu.dot_dimension_numbers<[1], [0], [0], [1], [0, 0, 1, 1], [], []>} : vector<16x32xf32>, vector<32x56xf32>, vector<16x56xf32> -> vector<16x56xf32>
    %c0_86 = arith.constant 0 : index
    %c0_87 = arith.constant 0 : index
    %178 = vector.load %arg20[%c0_86, %c0_87] : memref<1x56xf32, #tpu.memory_space<vmem>>, vector<1x56xf32>
    %179 = vector.broadcast %178 : vector<1x56xf32> to vector<16x56xf32>
    %180 = arith.addf %177, %179 : vector<16x56xf32>
    %c0_88 = arith.constant 0 : index
    %c0_89 = arith.constant 0 : index
    %181 = vector.load %arg5[%c0_88, %c0_89] : memref<16x16xf32, #tpu.memory_space<vmem>>, vector<16x16xf32>
    %cst_90 = arith.constant dense<0.000000e+00> : vector<16x8xf32>
    %182 = tpu.matmul %181, %135, %cst_90 {dimension_numbers = #tpu.dot_dimension_numbers<[1], [0], [0], [1], [0, 0, 1, 1], [], []>} : vector<16x16xf32>, vector<16x8xf32>, vector<16x8xf32> -> vector<16x8xf32>
    %cst_91 = arith.constant dense<0.000000e+00> : vector<16xf32>
    %183 = vector.multi_reduction <add>, %181, %cst_91 [1] : vector<16x16xf32> to vector<16xf32>
    %184 = vector.shape_cast %183 : vector<16xf32> to vector<16x1xf32>
    %cst_92 = arith.constant 1.000000e+00 : f32
    %185 = vector.broadcast %cst_92 : f32 to vector<16x1xf32>
    %186 = arith.maximumf %184, %185 : vector<16x1xf32>
    %187 = tpu.reciprocal %186 {approx = true} : vector<16x1xf32> -> vector<16x1xf32>
    %188 = vector.broadcast %187 : vector<16x1xf32> to vector<16x8xf32>
    %189 = arith.mulf %182, %188 : vector<16x8xf32>
    %c0_93 = arith.constant 0 : index
    %c0_94 = arith.constant 0 : index
    %190 = vector.load %arg6[%c0_93, %c0_94] : memref<16x16xf32, #tpu.memory_space<vmem>>, vector<16x16xf32>
    %cst_95 = arith.constant dense<0.000000e+00> : vector<16x8xf32>
    %191 = tpu.matmul %190, %137, %cst_95 {dimension_numbers = #tpu.dot_dimension_numbers<[1], [0], [0], [1], [0, 0, 1, 1], [], []>} : vector<16x16xf32>, vector<16x8xf32>, vector<16x8xf32> -> vector<16x8xf32>
    %cst_96 = arith.constant dense<0.000000e+00> : vector<16xf32>
    %192 = vector.multi_reduction <add>, %190, %cst_96 [1] : vector<16x16xf32> to vector<16xf32>
    %193 = vector.shape_cast %192 : vector<16xf32> to vector<16x1xf32>
    %cst_97 = arith.constant 1.000000e+00 : f32
    %194 = vector.broadcast %cst_97 : f32 to vector<16x1xf32>
    %195 = arith.maximumf %193, %194 : vector<16x1xf32>
    %196 = tpu.reciprocal %195 {approx = true} : vector<16x1xf32> -> vector<16x1xf32>
    %197 = vector.broadcast %196 : vector<16x1xf32> to vector<16x8xf32>
    %198 = arith.mulf %191, %197 : vector<16x8xf32>
    %cst_98 = arith.constant 0.000000e+00 : f32
    %199 = vector.broadcast %cst_98 : f32 to vector<16x14xf32>
    %200 = tpu.concatenate %135, %137, %189, %198, %136, %138, %162, %180, %156, %157, %199 in 1 : vector<16x8xf32>, vector<16x8xf32>, vector<16x8xf32>, vector<16x8xf32>, vector<16x8xf32>, vector<16x8xf32>, vector<16x8xf32>, vector<16x56xf32>, vector<16x1xf32>, vector<16x1xf32>, vector<16x14xf32> -> vector<16x128xf32>
    %c0_99 = arith.constant 0 : index
    %c0_100 = arith.constant 0 : index
    %201 = vector.load %arg21[%c0_99, %c0_100] : memref<16x128xf32, #tpu.memory_space<vmem>>, vector<16x128xf32>
    tpu.vector_store %arg21[%c0_99, %c0_100], %200 {strides = array<i32>} : memref<16x128xf32, #tpu.memory_space<vmem>>, vector<16x128xf32>,
    return
  }
}

</mosaic_0001>

<bundles_post_ra>
// kernel: spatial_mosi_att_forward.1
= control target key start
LH: loop header
LB: loop body
LE: loop exit
PB: predicated region body
PF: predicated region fallthrough
CT: control target
= control target key end

     0   :  { %vm163_vm0 = vcmask 195584   ;;  %vm78_vm1 = vcmask 261120   ;;  %v2141_v14 = vmov 0.0|0.0   ;;  %vm2142_vm2 = vmmov 0   ;;  %s2146_s27 = smov 32   ;;  %s2559_s7 = inlined_call_operand.vmem [shape: f32[32,16], index: 7, kind: input, shape index: {}]   ;;  %s2560_s11 = inlined_call_operand.vmem [shape: f32[24,16], index: 11, kind: input, shape index: {}]   ;;  %s2561_s1 = inlined_call_operand.vmem [shape: f32[16,24], index: 1, kind: input, shape index: {}]   ;;  %s2562_s0 = inlined_call_operand.vmem [shape: f32[16,32], index: 0, kind: input, shape index: {}]   ;;  %s2563_s13 = inlined_call_operand.vmem [shape: f32[1,16], index: 13, kind: input, shape index: {}]   ;;  %s2564_s9 = inlined_call_operand.vmem [shape: f32[1,16], index: 9, kind: input, shape index: {}]   ;;  %s2565_s12 = inlined_call_operand.vmem [shape: f32[1,16], index: 12, kind: input, shape index: {}]   ;;  %s2566_s8 = inlined_call_operand.vmem [shape: f32[1,16], index: 8, kind: input, shape index: {}]   ;;  %s2567_s2 = inlined_call_operand.vmem [shape: f32[16,16], index: 2, kind: input, shape index: {}]   ;;  %s2568_s3 = inlined_call_operand.vmem [shape: f32[16,16], index: 3, kind: input, shape index: {}]   ;;  %s2569_s4 = inlined_call_operand.vmem [shape: f32[16,16], index: 4, kind: input, shape index: {}]   ;;  %s2570_s10 = inlined_call_operand.vmem [shape: f32[16,8], index: 10, kind: input, shape index: {}]   ;;  %s2571_s14 = inlined_call_operand.vmem [shape: f32[16,8], index: 14, kind: input, shape index: {}]   ;;  %s2572_s15 = inlined_call_operand.vmem [shape: f32[8,8], index: 15, kind: input, shape index: {}]   ;;  %s2573_s17 = inlined_call_operand.vmem [shape: f32[8,32], index: 17, kind: input, shape index: {}]   ;;  %s2574_s16 = inlined_call_operand.vmem [shape: f32[8,1], index: 16, kind: input, shape index: {}]   ;;  %s2575_s19 = inlined_call_operand.vmem [shape: f32[32,56], index: 19, kind: input, shape index: {}]   ;;  %s2576_s5 = inlined_call_operand.vmem [shape: f32[16,16], index: 5, kind: input, shape index: {}]   ;;  %s2577_s6 = inlined_call_operand.vmem [shape: f32[16,16], index: 6, kind: input, shape index: {}]   ;;  %s2578_s18 = inlined_call_operand.vmem [shape: f32[1,32], index: 18, kind: input, shape index: {}]   ;;  %s2579_s20 = inlined_call_operand.vmem [shape: f32[1,56], index: 20, kind: input, shape index: {}]   ;;  %s2580_s21 = inlined_call_operand.vmem [shape: f32[16,128], index: 21, kind: output, shape index: {}]  }
   0x1   :  { %2585 = sst [smem:[#allocation2_spill]] %s2559_s7  ;;  %v2143_v15 = vmov 0.0   ;;  %vm255_vm3 = vcmask 130048   ;;  %v353_v31 = vld [vmem:[%s2565_s12] sm:$0x1]  ;;  %v341_v34 = vlaneseq  ;;  %v461_v44 = vld [vmem:[%s2567_s2 + $0x8] sm:$0xff] }
   0x2   :  { %2586 = sst [smem:[#allocation3_spill]] %s2560_s11  ;;  %s2591_s26 = sld [smem:[#allocation2_spill]]  ;;  %vm2008_vm4 = vmpackc.low %vm255_vm3, %vm255_vm3  ;;  %v245_v33 = vld [vmem:[%s2566_s8] sm:$0x1]  ;;  %vm463_vm6 = vcmp.gt.f32.partialorder %v461_v44, 0.0  ;;  %v523_v54 = vld [vmem:[%s2568_s3 + $0x8] sm:$0xff] }
   0x3   :  { %2587 = sst [smem:[#allocation4_spill]] %s2561_s1  ;;  %s2592_s7 = sld [smem:[#allocation3_spill]]  ;;  %v342_v35 = vshrl.u32 %v341_v34, 7  ;;  %v2324_v43 = vld [vmem:[%s2567_s2] sm:$0xff]  ;;  %vm525_vm12 = vcmp.gt.f32.partialorder %v523_v54, 0.0 }
   0x4   :  { %2588 = sst [smem:[#allocation5_spill]] %s2562_s0  ;;  %s2593_s25 = sld [smem:[#allocation4_spill]]  ;;  %vm462_vm5 = vcmp.gt.f32.partialorder %v2324_v43, 0.0  ;;  %v522_v53 = vld [vmem:[%s2568_s3] sm:$0xff] }
   0x5   :  { %2589 = sst [smem:[#allocation6_spill]] %s2563_s13  ;;  %s2594_s13 = sld [smem:[#allocation5_spill]]  ;;  %v343_v38 = vsub.s32 0, %v342_v35  ;;  %vm524_vm11 = vcmp.gt.f32.partialorder %v522_v53, 0.0 }
   0x6   :  { %2590 = sst [smem:[#allocation7_spill]] %s2564_s9  ;;  %s2595_s11 = sld [smem:[#allocation6_spill]] }
   0x7   :  { %s2147_s0 = smov 40   ;;  %s2150_s12 = smov 56  }
   0x8   :  { %v74_v0 = vld [vmem:[%s2591_s26] sm:$0xff]  ;;  %v75_v1 = vld [vmem:[%s2591_s26 + $0x8] sm:$0xff]  ;;  %v76_v5 = vld [vmem:[%s2591_s26 + $0x10] sm:$0xff] }
   0x9   :  { %v160_v2 = vld [vmem:[%s2592_s7] sm:$0xff]  ;;  %v1994_v3 = vpack.c.bf16 %v75_v1, %v74_v0  ;;  %v161_v4 = vld [vmem:[%s2592_s7 + $0x8] sm:$0xff]  ;;  %v77_v6 = vld [vmem:[%s2591_s26 + $0x18] sm:$0xff] }
   0xa   :  { %v2002_v7 = vpack.c.bf16 %v161_v4, %v160_v2  ;;  %v1998_v8 = vpack.c.bf16 %v77_v6, %v76_v5  ;;  %v70_v9 = vld [vmem:[%s2593_s25] sm:$0xff]  ;;  %v162_v10 = vld [vmem:[%s2592_s7 + $0x10] sm:$0xff]  ;;  %v71_v12 = vld [vmem:[%s2593_s25 + $0x8] sm:$0xff]  ;;  %s2596_s25 = sld [smem:[#allocation7_spill]] }
   0xb   :  { %1995 = vmatprep.subr.bf16.mxu0 %v1994_v3  ;;  %1891 = vmatprep.mubr.msk.f32.mxu1 %vm163_vm0, %v70_v9  ;;  %v68_v11 = vld [vmem:[%s2594_s13] sm:$0xff]  ;;  %v69_v13 = vld [vmem:[%s2594_s13 + $0x8] sm:$0xff]  ;;  %s2151_s13 = smov 24  }
   0xc   :  { %2003 = vmatprep.subr.bf16.mxu1 %v2002_v7  ;;  %1997 = vmatpush3.bf16.msra.mxu0 %v1994_v3  ;;  %v1758_v16 = vld [vmem:[%s2595_s11] ss:$0 sm:$0xff] }
   0xd   :  { %2005 = vmatpush3.bf16.msra.mxu1 %v2002_v7  ;;  %1999 = vmatprep.subr.bf16.mxu0 %v1998_v8 }
   0xe   :  { %1889 = vmatprep.subr.mxu1 %v162_v10  ;;  %1882 = vmatprep.mubr.msk.f32.mxu0 %vm78_vm1, %v68_v11 }
  0x10   :  { %2001 = vmatpush3.bf16.msra.mxu0 %v1998_v8  ;;  %v1754_v18 = vld [vmem:[%s2596_s25] ss:$0 sm:$0xff] }
  0x11   :  { %1890 = vmatpush3.msra.mxu1 %v162_v10  ;;  %2010 = vmatprep.subr.bf16.mxu0 %v2141_v14 }
  0x12   :  { %1892 = vmatmul.mubr.msk.f32.vlgmr.msra.gmra.mrb[0].mxu1 %vm163_vm0, %v71_v12  ;;  %2006 = vmatprep.subr.bf16.mxu1 %v2141_v14 }
  0x13   :  { %1883 = vmatmul.mubr.msk.f32.vlgmr.msra.gmra.mrb[0].mxu0 %vm78_vm1, %v69_v13  ;;  %1898 = vmatprep.mubr.msk.f32.mxu1 %vm2142_vm2, %v2143_v15 }
  0x14   :  { %1905 = vmatprep.mubr.msk.f32.mxu0 %vm2142_vm2, %v2143_v15 }
  0xe5   :  { %v1893_v17 = vpop.f32.mrb[0].mxu1 }
  0xe6   :  { %v236_v19 = vpop.f32.mrb[1].mxu1  ;;  %v1884_v20 = vpop.f32.mrb[0].mxu0  ;;  %v362_v21 = vmul.f32 %v1893_v17, %v1758_v16 }
  0xe7   :  { %v2011_v22 = vpack.c.bf16 %v1893_v17, %v236_v19  ;;  %v151_v23 = vpop.f32.mrb[1].mxu0  ;;  %v361_v24 = vmul.f32 %v1758_v16, %v236_v19  ;;  %v254_v28 = vmul.f32 %v1884_v20, %v1754_v18 }
  0xe8   :  { %v2007_v25 = vpack.c.bf16 %v1884_v20, %v151_v23  ;;  %v253_v26 = vmul.f32 %v1754_v18, %v151_v23  ;;  %v366_v30 = vsel %vm255_vm3, %v362_v21, 0.0 }
  0xe9   :  { %2013 = vmatpush3.bf16.xpose.msk.msra.mxu0 %vm2008_vm4, %v2011_v22  ;;  %v363_v27 = vsel %vm255_vm3, %v361_v24, 0.0  ;;  %v259_v32 = vsel %vm255_vm3, %v254_v28, 0.0 }
  0xea   :  { %364 = vadd.xlane.f32.xlu1 %v363_v27  ;;  %2009 = vmatpush3.bf16.xpose.msk.msra.mxu1 %vm2008_vm4, %v2007_v25  ;;  %v256_v29 = vsel %vm255_vm3, %v253_v26, 0.0  ;;  %v2358_v27 = vld [vmem:[%s2569_s4] sm:$0xff] }
  0xeb   :  { %2015 = vmatprep.subr.bf16.mxu1 %v2007_v25  ;;  %257 = vadd.xlane.f32.xlu0 %v256_v29  ;;  %vm492_vm14 = vcmp.gt.f32.partialorder %v2358_v27, 0.0 }
  0xec   :  { %2019 = vmatprep.subr.bf16.mxu0 %v2011_v22 }
  0xee   :  { %367 = vadd.xlane.f32.xlu1 %v366_v30 }
  0xef   :  { %260 = vadd.xlane.f32.xlu0 %v259_v32 }
  0xf0   :  { %1906 = vmatmul.mubr.msk.f32.vlgmr.msra.gmra.mrb[2].mxu0 %vm255_vm3, %v353_v31 }
  0xf1   :  { %2021 = vmatpush3.bf16.msra.mxu0 %v2011_v22  ;;  %1899 = vmatmul.mubr.msk.f32.vlgmr.msra.gmra.mrb[2].mxu1 %vm255_vm3, %v245_v33 }
  0xf2   :  { %2017 = vmatpush3.bf16.msra.mxu1 %v2007_v25  ;;  %v2353_v25 = vld [vmem:[%s2569_s4 + $0x8] sm:$0xff] }
  0xf3   :  { %vm493_vm13 = vcmp.gt.f32.partialorder %v2353_v25, 0.0 }
 0x177   :  { %v365_v36 = vpop.xlane.xlu1 %364 }
 0x178   :  { %v258_v37 = vpop.xlane.xlu0 %257 }
 0x17b   :  { %v368_v45 = vpop.xlane.xlu1 %367 }
 0x17c   :  { %v261_v48 = vpop.xlane.xlu0 %260 }
 0x1c3   :  { %v444_v39 = vpop.f32.mrb[2].mxu0 }
 0x1c4   :  { %v451_v40 = vrot.slane %v444_v39, %v343_v38  ;;  %v337_v41 = vpop.f32.mrb[2].mxu1  ;;  %v1907_v42 = vpop.f32.mrb[3].mxu0 }
 0x1c5   :  { %v344_v46 = vrot.slane %v337_v41, %v343_v38  ;;  %v1900_v47 = vpop.f32.mrb[3].mxu1 }
 0x1c6   :  { %v452_v49 = vadd.f32 %v451_v40, %v365_v36  ;;  %v453_v50 = vadd.f32 %v451_v40, %v368_v45 }
 0x1c7   :  { %v345_v51 = vadd.f32 %v344_v46, %v258_v37  ;;  %v346_v52 = vadd.f32 %v344_v46, %v261_v48 }
 0x1c8   :  { %vm454_vm7 = vcmp.gt.f32.partialorder %v452_v49, 0.0  ;;  %v456_v55 = vmul.f32 0.2, %v452_v49  ;;  %vm455_vm8 = vcmp.gt.f32.partialorder %v453_v50, 0.0  ;;  %v457_v56 = vmul.f32 0.2, %v453_v50 }
 0x1c9   :  { %vm347_vm9 = vcmp.gt.f32.partialorder %v345_v51, 0.0  ;;  %v349_v57 = vmul.f32 0.2, %v345_v51  ;;  %vm348_vm10 = vcmp.gt.f32.partialorder %v346_v52, 0.0  ;;  %v350_v58 = vmul.f32 0.2, %v346_v52 }
 0x1ca   :  { %v458_v61 = vsel %vm454_vm7, %v452_v49, %v456_v55  ;;  %v459_v62 = vsel %vm455_vm8, %v453_v50, %v457_v56 }
 0x1cb   :  { %v351_v59 = vsel %vm347_vm9, %v345_v51, %v349_v57  ;;  %v352_v60 = vsel %vm348_vm10, %v346_v52, %v350_v58  ;;  %v526_v3 = vsel %vm524_vm11, %v458_v61, -1e+30  ;;  %v527_v4 = vsel %vm525_vm12, %v459_v62, -1e+30 }
 0x1cc   :  { %v464_v63 = vsel %vm462_vm5, %v351_v59, -1e+30  ;;  %v465_v0 = vsel %vm463_vm6, %v352_v60, -1e+30  ;;  %v528_v5 = vsel %vm255_vm3, %v526_v3, -inf  ;;  %v531_v6 = vsel %vm255_vm3, %v527_v4, -inf }
 0x1cd   :  { %v466_v1 = vsel %vm255_vm3, %v464_v63, -inf  ;;  %v469_v2 = vsel %vm255_vm3, %v465_v0, -inf  ;;  %v495_v33 = vsel %vm493_vm13, %v352_v60, -1e+30  ;;  %v494_v34 = vsel %vm492_vm14, %v351_v59, -1e+30 }
 0x1ce   :  { %467 = vmax.xlane.f32.xlu0 %v466_v1  ;;  %470 = vmax.xlane.f32.xlu1 %v469_v2  ;;  %v499_v35 = vsel %vm255_vm3, %v495_v33, -inf  ;;  %v496_v36 = vsel %vm255_vm3, %v494_v34, -inf  ;;  %v555_v37 = vsel %vm493_vm13, %v459_v62, -1e+30  ;;  %v554_v38 = vsel %vm492_vm14, %v458_v61, -1e+30 }
 0x1cf   :  { %v559_v39 = vsel %vm255_vm3, %v555_v37, -inf  ;;  %v556_v40 = vsel %vm255_vm3, %v554_v38, -inf  ;;  %vm1023_vm10 = vcmask 64512  }
 0x1d2   :  { %529 = vmax.xlane.f32.xlu0 %v528_v5  ;;  %532 = vmax.xlane.f32.xlu1 %v531_v6 }
 0x25b   :  { %v471_v7 = vpop.xlane.xlu1 %470  ;;  %v468_v8 = vpop.xlane.xlu0 %467 }
 0x25c   :  { %v473_v9 = vsub.f32 %v465_v0, %v471_v7  ;;  %v472_v10 = vsub.f32 %v464_v63, %v468_v8 }
 0x25e   :  { %v476_v11 = vmul.f32 1.442695, %v473_v9  ;;  %v474_v12 = vmul.f32 1.442695, %v472_v10 }
 0x25f   :  { %v533_v13 = vpop.xlane.xlu1 %532  ;;  %v530_v14 = vpop.xlane.xlu0 %529 }
 0x260   :  { %2061 = vpow2.f32 %v476_v11  ;;  %v535_v15 = vsub.f32 %v527_v4, %v533_v13  ;;  %v534_v16 = vsub.f32 %v526_v3, %v530_v14 }
 0x261   :  { %2063 = vpow2.f32 %v474_v12 }
 0x262   :  { %v538_v17 = vmul.f32 1.442695, %v535_v15  ;;  %v536_v18 = vmul.f32 1.442695, %v534_v16 }
 0x264   :  { %2065 = vpow2.f32 %v538_v17  ;;  %v824_v17 = vld [vmem:[%s2570_s10] sm:$0xff] }
 0x265   :  { %2067 = vpow2.f32 %v536_v18  ;;  %v825_v18 = vld [vmem:[%s2570_s10 + $0x8] sm:$0xff]  ;;  %s2149_s10 = smov 16  }
 0x26a   :  { %v2062_v19 = vpop.eup %2061 }
 0x26b   :  { %v2064_v20 = vpop.eup %2063  ;;  %v479_v21 = vsel %vm463_vm6, %v2062_v19, 0.0  ;;  %v2022_v19 = vpack.c.bf16 %v825_v18, %v824_v17 }
 0x26c   :  { %v483_v22 = vsel %vm255_vm3, %v479_v21, 0.0  ;;  %v478_v23 = vsel %vm462_vm5, %v2064_v20, 0.0  ;;  %v923_v20 = vld [vmem:[%s2571_s14] sm:$0xff] }
 0x26d   :  { %484 = vadd.xlane.f32.xlu1 %v483_v22  ;;  %v480_v24 = vsel %vm255_vm3, %v478_v23, 0.0  ;;  %2023 = vmatprep.subr.bf16.mxu1 %v2022_v19 }
 0x26e   :  { %v2066_v26 = vpop.eup %2065  ;;  %481 = vadd.xlane.f32.xlu0 %v480_v24 }
 0x26f   :  { %v2068_v28 = vpop.eup %2067  ;;  %v541_v29 = vsel %vm525_vm12, %v2066_v26, 0.0 }
 0x270   :  { %v545_v30 = vsel %vm255_vm3, %v541_v29, 0.0  ;;  %v540_v31 = vsel %vm524_vm11, %v2068_v28, 0.0 }
 0x271   :  { %546 = vadd.xlane.f32.xlu1 %v545_v30  ;;  %v542_v32 = vsel %vm255_vm3, %v540_v31, 0.0 }
 0x272   :  { %543 = vadd.xlane.f32.xlu0 %v542_v32 }
 0x275   :  { %500 = vmax.xlane.f32.xlu1 %v499_v35 }
 0x276   :  { %497 = vmax.xlane.f32.xlu0 %v496_v36 }
 0x279   :  { %560 = vmax.xlane.f32.xlu1 %v559_v39 }
 0x27a   :  { %557 = vmax.xlane.f32.xlu0 %v556_v40 }
 0x2fa   :  { %v485_v41 = vpop.xlane.xlu1 %484 }
 0x2fb   :  { %v487_v42 = vmax.f32 %v485_v41, 1e-30  ;;  %v482_v43 = vpop.xlane.xlu0 %481 }
 0x2fc   :  { %v486_v44 = vmax.f32 %v482_v43, 1e-30 }
 0x2fd   :  { %2069 = vrcp.f32 %v487_v42 }
 0x2fe   :  { %2071 = vrcp.f32 %v486_v44  ;;  %v547_v45 = vpop.xlane.xlu1 %546 }
 0x2ff   :  { %v549_v46 = vmax.f32 %v547_v45, 1e-30  ;;  %v544_v47 = vpop.xlane.xlu0 %543 }
 0x300   :  { %v548_v48 = vmax.f32 %v544_v47, 1e-30 }
 0x301   :  { %2073 = vrcp.f32 %v549_v46 }
 0x302   :  { %2075 = vrcp.f32 %v548_v48  ;;  %v501_v49 = vpop.xlane.xlu1 %500 }
 0x303   :  { %v503_v50 = vsub.f32 %v495_v33, %v501_v49  ;;  %v498_v51 = vpop.xlane.xlu0 %497 }
 0x304   :  { %v502_v52 = vsub.f32 %v494_v34, %v498_v51 }
 0x305   :  { %v506_v53 = vmul.f32 1.442695, %v503_v50 }
 0x306   :  { %v504_v54 = vmul.f32 1.442695, %v502_v52  ;;  %v561_v55 = vpop.xlane.xlu1 %560 }
 0x307   :  { %v2070_v56 = vpop.eup %2069  ;;  %2077 = vpow2.f32 %v506_v53  ;;  %v563_v57 = vsub.f32 %v555_v37, %v561_v55  ;;  %v558_v58 = vpop.xlane.xlu0 %557 }
 0x308   :  { %v2072_v59 = vpop.eup %2071  ;;  %2079 = vpow2.f32 %v504_v54  ;;  %v562_v60 = vsub.f32 %v554_v38, %v558_v58  ;;  %v491_v61 = vmul.f32 %v2070_v56, %v479_v21  ;;  %v924_v21 = vld [vmem:[%s2571_s14 + $0x8] sm:$0xff] }
 0x309   :  { %v566_v62 = vmul.f32 1.442695, %v563_v57  ;;  %v490_v63 = vmul.f32 %v2072_v59, %v478_v23  ;;  %v2026_v22 = vpack.c.bf16 %v924_v21, %v923_v20 }
 0x30a   :  { %v564_v0 = vmul.f32 1.442695, %v562_v60 }
 0x30b   :  { %v2074_v1 = vpop.eup %2073  ;;  %2081 = vpow2.f32 %v566_v62  ;;  %1912 = vmatprep.mubr.msk.f32.mxu1 %vm255_vm3, %v490_v63  ;;  %2027 = vmatprep.subr.bf16.mxu0 %v2026_v22  ;;  %v1022_v63 = vld [vmem:[%s2572_s15] sm:$0xff]  ;;  %s2152_s15 = smov 112  }
 0x30c   :  { %v2076_v2 = vpop.eup %2075  ;;  %2083 = vpow2.f32 %v564_v0  ;;  %1913 = vmatmul.mubr.msk.f32.vlgmr.msra.gmra.mrb[4].mxu1 %vm255_vm3, %v491_v61  ;;  %v553_v3 = vmul.f32 %v2074_v1, %v541_v29  ;;  %v1271_v0 = vld [vmem:[%s2573_s17] sm:$0xff] }
 0x30d   :  { %v552_v4 = vmul.f32 %v2076_v2, %v540_v31  ;;  %2025 = vmatpush3.bf16.msra.mxu1 %v2022_v19 }
 0x30e   :  { %1948 = vmatprep.subr.mxu1 %v1022_v63 }
 0x30f   :  { %1922 = vmatprep.mubr.msk.f32.mxu0 %vm255_vm3, %v552_v4 }
 0x310   :  { %1923 = vmatmul.mubr.msk.f32.vlgmr.msra.gmra.mrb[4].mxu0 %vm255_vm3, %v553_v3 }
 0x311   :  { %v2078_v5 = vpop.eup %2077  ;;  %2029 = vmatpush3.bf16.msra.mxu0 %v2026_v22 }
 0x312   :  { %v2080_v6 = vpop.eup %2079  ;;  %v509_v7 = vsel %vm493_vm13, %v2078_v5, 0.0 }
 0x313   :  { %v513_v8 = vsel %vm255_vm3, %v509_v7, 0.0  ;;  %v508_v9 = vsel %vm492_vm14, %v2080_v6, 0.0 }
 0x314   :  { %514 = vadd.xlane.f32.xlu1 %v513_v8  ;;  %v510_v10 = vsel %vm255_vm3, %v508_v9, 0.0 }
 0x315   :  { %v2082_v11 = vpop.eup %2081  ;;  %511 = vadd.xlane.f32.xlu0 %v510_v10 }
 0x316   :  { %v2084_v12 = vpop.eup %2083  ;;  %v569_v13 = vsel %vm493_vm13, %v2082_v11, 0.0  ;;  %vm1726_vm13 = vcmask 326656  }
 0x317   :  { %v573_v14 = vsel %vm255_vm3, %v569_v13, 0.0  ;;  %v568_v15 = vsel %vm492_vm14, %v2084_v12, 0.0  ;;  %vm1729_vm14 = vcmask 392192  }
 0x318   :  { %574 = vadd.xlane.f32.xlu1 %v573_v14  ;;  %v570_v16 = vsel %vm255_vm3, %v568_v15, 0.0 }
 0x319   :  { %571 = vadd.xlane.f32.xlu0 %v570_v16 }
 0x3a1   :  { %v515_v23 = vpop.xlane.xlu1 %514 }
 0x3a2   :  { %v517_v24 = vmax.f32 %v515_v23, 1e-30  ;;  %v512_v25 = vpop.xlane.xlu0 %511 }
 0x3a3   :  { %v516_v26 = vmax.f32 %v512_v25, 1e-30 }
 0x3a4   :  { %2085 = vrcp.f32 %v517_v24 }
 0x3a5   :  { %2087 = vrcp.f32 %v516_v26  ;;  %v575_v27 = vpop.xlane.xlu1 %574 }
 0x3a6   :  { %v577_v28 = vmax.f32 %v575_v27, 1e-30  ;;  %v572_v29 = vpop.xlane.xlu0 %571 }
 0x3a7   :  { %v576_v30 = vmax.f32 %v572_v29, 1e-30 }
 0x3a8   :  { %2089 = vrcp.f32 %v577_v28 }
 0x3a9   :  { %2091 = vrcp.f32 %v576_v30 }
 0x3ae   :  { %v2086_v31 = vpop.eup %2085 }
 0x3af   :  { %v2088_v32 = vpop.eup %2087  ;;  %v521_v33 = vmul.f32 %v2086_v31, %v509_v7  ;;  %v1125_v31 = vld [vmem:[%s2574_s16] sm:$0xff] }
 0x3b0   :  { %v520_v34 = vmul.f32 %v2088_v32, %v508_v9  ;;  %1956 = vmatprep.subr.mxu0 %v1125_v31  ;;  %v1372_v32 = vld [vmem:[%s2575_s19] sm:$0xff] }
 0x3b2   :  { %v2090_v35 = vpop.eup %2089  ;;  %1915 = vmatprep.mubr.msk.f32.mxu1 %vm255_vm3, %v520_v34 }
 0x3b3   :  { %v2092_v36 = vpop.eup %2091  ;;  %1916 = vmatmul.mubr.msk.f32.gmra.mrb[6].mxu1 %vm255_vm3, %v521_v33  ;;  %v581_v37 = vmul.f32 %v2090_v35, %v569_v13  ;;  %v1373_v33 = vld [vmem:[%s2575_s19 + $0x8] sm:$0xff] }
 0x3b4   :  { %v580_v38 = vmul.f32 %v2092_v36, %v568_v15  ;;  %v2030_v34 = vpack.c.bf16 %v1373_v33, %v1372_v32 }
 0x3b6   :  { %1925 = vmatprep.mubr.msk.f32.mxu0 %vm255_vm3, %v580_v38 }
 0x3b7   :  { %1926 = vmatmul.mubr.msk.f32.gmra.mrb[6].mxu0 %vm255_vm3, %v581_v37 }
 0x3df   :  { %v1914_v39 = vpop.f32.mrb[4].mxu1 }
 0x3e0   :  { %v684_v40 = vmin.f32 %v1914_v39, 0.0  ;;  %v660_v41 = vpop.f32.mrb[5].mxu1  ;;  %vm680_vm2 = vcmp.gt.f32.partialorder %v1914_v39, 0.0 }
 0x3e1   :  { %v683_v42 = vmin.f32 %v660_v41, 0.0  ;;  %vm679_vm15 = vcmp.gt.f32.partialorder %v660_v41, 0.0 }
 0x3e2   :  { %v689_v43 = vmul.f32 1.442695, %v684_v40 }
 0x3e3   :  { %v687_v44 = vmul.f32 1.442695, %v683_v42  ;;  %v1924_v45 = vpop.f32.mrb[4].mxu0 }
 0x3e4   :  { %2093 = vpow2.f32 %v689_v43  ;;  %v805_v46 = vmin.f32 %v1924_v45, 0.0  ;;  %v781_v47 = vpop.f32.mrb[5].mxu0  ;;  %vm801_vm5 = vcmp.gt.f32.partialorder %v1924_v45, 0.0  ;;  %v1374_v43 = vld [vmem:[%s2575_s19 + $0x10] sm:$0xff] }
 0x3e5   :  { %2095 = vpow2.f32 %v687_v44  ;;  %v804_v48 = vmin.f32 %v781_v47, 0.0  ;;  %vm800_vm4 = vcmp.gt.f32.partialorder %v781_v47, 0.0  ;;  %v1375_v44 = vld [vmem:[%s2575_s19 + $0x18] sm:$0xff] }
 0x3e6   :  { %v810_v49 = vmul.f32 1.442695, %v805_v46  ;;  %v2034_v46 = vpack.c.bf16 %v1375_v44, %v1374_v43 }
 0x3e7   :  { %v808_v50 = vmul.f32 1.442695, %v804_v48 }
 0x3e8   :  { %2097 = vpow2.f32 %v810_v49 }
 0x3e9   :  { %2099 = vpow2.f32 %v808_v50  ;;  %v2144_v50 = vmov 0  }
 0x3ea   :  { %2060 = vset.pattern.permute.xlu1 %v2144_v50  ;;  %2059 = vset.pattern.permute.xlu0 %v2144_v50 }
 0x3ee   :  { %v2094_v51 = vpop.eup %2093 }
 0x3ef   :  { %v2096_v52 = vpop.eup %2095  ;;  %v1767_v53 = vadd.f32 -1.0, %v2094_v51 }
 0x3f0   :  { %v1766_v54 = vadd.f32 -1.0, %v2096_v52 }
 0x3f1   :  { %v700_v58 = vsel %vm680_vm2, %v1914_v39, %v1767_v53  ;;  %vm1735_vm2 = vcmask 916480  }
 0x3f2   :  { %v2098_v55 = vpop.eup %2097  ;;  %v699_v56 = vsel %vm679_vm15, %v660_v41, %v1766_v54  ;;  %vm1732_vm15 = vcmask 457728  }
 0x3f3   :  { %v2100_v57 = vpop.eup %2099  ;;  %v1775_v59 = vadd.f32 -1.0, %v2098_v55  ;;  %1932 = vmatprep.mubr.msk.f32.mxu1 %vm255_vm3, %v699_v56 }
 0x3f4   :  { %v1774_v60 = vadd.f32 -1.0, %v2100_v57  ;;  %1933 = vmatmul.mubr.msk.f32.vlgmr.msra.gmra.mrb[8].mxu1 %vm255_vm3, %v700_v58 }
 0x3f5   :  { %v821_v62 = vsel %vm801_vm5, %v1924_v45, %v1775_v59  ;;  %1949 = vmatpush3.msra.mxu1 %v1022_v63 }
 0x3f6   :  { %v820_v61 = vsel %vm800_vm4, %v781_v47, %v1774_v60  ;;  %1964 = vmatprep.subr.mxu1 %v1271_v0  ;;  %vm1741_vm4 = vcmask 932864  }
 0x3f7   :  { %1942 = vmatprep.mubr.msk.f32.mxu0 %vm255_vm3, %v820_v61 }
 0x3f8   :  { %1943 = vmatmul.mubr.msk.f32.vlgmr.msra.gmra.mrb[8].mxu0 %vm255_vm3, %v821_v62 }
 0x3f9   :  { %1957 = vmatpush3.msra.mxu0 %v1125_v31 }
 0x3fa   :  { %2031 = vmatprep.subr.bf16.mxu0 %v2030_v34 }
 0x486   :  { %v1917_v1 = vpop.f32.mrb[6].mxu1 }
 0x487   :  { %v686_v2 = vmin.f32 %v1917_v1, 0.0  ;;  %v670_v3 = vpop.f32.mrb[7].mxu1  ;;  %vm682_vm7 = vcmp.gt.f32.partialorder %v1917_v1, 0.0 }
 0x488   :  { %v685_v4 = vmin.f32 %v670_v3, 0.0  ;;  %vm681_vm6 = vcmp.gt.f32.partialorder %v670_v3, 0.0 }
 0x489   :  { %v693_v5 = vmul.f32 1.442695, %v686_v2 }
 0x48a   :  { %v691_v6 = vmul.f32 1.442695, %v685_v4  ;;  %v1927_v7 = vpop.f32.mrb[6].mxu0 }
 0x48b   :  { %2101 = vpow2.f32 %v693_v5  ;;  %v807_v8 = vmin.f32 %v1927_v7, 0.0  ;;  %v791_v9 = vpop.f32.mrb[7].mxu0  ;;  %vm803_vm9 = vcmp.gt.f32.partialorder %v1927_v7, 0.0 }
 0x48c   :  { %2103 = vpow2.f32 %v691_v6  ;;  %v806_v10 = vmin.f32 %v791_v9, 0.0  ;;  %vm802_vm8 = vcmp.gt.f32.partialorder %v791_v9, 0.0 }
 0x48d   :  { %v814_v11 = vmul.f32 1.442695, %v807_v8 }
 0x48e   :  { %v812_v12 = vmul.f32 1.442695, %v806_v10 }
 0x48f   :  { %2105 = vpow2.f32 %v814_v11 }
 0x490   :  { %2107 = vpow2.f32 %v812_v12 }
 0x495   :  { %v2102_v13 = vpop.eup %2101 }
 0x496   :  { %v2104_v14 = vpop.eup %2103  ;;  %v1769_v15 = vadd.f32 -1.0, %v2102_v13 }
 0x497   :  { %v1768_v16 = vadd.f32 -1.0, %v2104_v14 }
 0x498   :  { %v702_v21 = vsel %vm682_vm7, %v1917_v1, %v1769_v15 }
 0x499   :  { %v2106_v17 = vpop.eup %2105  ;;  %v701_v18 = vsel %vm681_vm6, %v670_v3, %v1768_v16 }
 0x49a   :  { %v2108_v19 = vpop.eup %2107  ;;  %v1777_v20 = vadd.f32 -1.0, %v2106_v17  ;;  %1935 = vmatprep.mubr.msk.f32.mxu1 %vm255_vm3, %v701_v18  ;;  %v1465_v17 = vld [vmem:[%s2576_s5 + $0x8] sm:$0xff] }
 0x49b   :  { %v1776_v22 = vadd.f32 -1.0, %v2108_v19  ;;  %1936 = vmatmul.mubr.msk.f32.gmra.mrb[10].mxu1 %vm255_vm3, %v702_v21  ;;  %v1550_v18 = vsel %vm255_vm3, %v1465_v17, 0.0  ;;  %v1464_v19 = vld [vmem:[%s2576_s5] sm:$0xff]  ;;  %s2145_s5 = smov 8  }
 0x49c   :  { %v823_v24 = vsel %vm803_vm9, %v1927_v7, %v1777_v20  ;;  %v1547_v20 = vsel %vm255_vm3, %v1464_v19, 0.0  ;;  %v2500_v21 = vld [vmem:[%s2577_s6] sm:$0xff] }
 0x49d   :  { %v822_v23 = vsel %vm802_vm8, %v791_v9, %v1776_v22  ;;  %v1642_v22 = vsel %vm255_vm3, %v2500_v21, 0.0 }
 0x49e   :  { %1945 = vmatprep.mubr.msk.f32.mxu0 %vm255_vm3, %v822_v23  ;;  %v2507_v23 = vld [vmem:[%s2577_s6 + $0x8] sm:$0xff]  ;;  %s2148_s6 = smov 48  }
 0x49f   :  { %1946 = vmatmul.mubr.msk.f32.gmra.mrb[10].mxu0 %vm255_vm3, %v823_v24  ;;  %v1645_v24 = vsel %vm255_vm3, %v2507_v23, 0.0 }
 0x4c7   :  { %v2424_v25 = vpop.f32.mrb[8].mxu1 }
 0x4c8   :  { %v2426_v26 = vpop.f32.mrb[9].mxu1 }
 0x4c9   :  { %1950 = vmatprep.mubr.msk.f32.mxu1 %vm1023_vm10, %v2426_v26  ;;  %v2432_v27 = vpack.c.bf16 %v2424_v25, %v2426_v26 }
 0x4ca   :  { %1951 = vmatmul.mubr.msk.f32.vlgmr.msra.gmra.mrb[12].mxu1 %vm1023_vm10, %v2424_v25 }
 0x4cb   :  { %1965 = vmatpush3.msra.mxu1 %v1271_v0  ;;  %v2436_v28 = vpop.f32.mrb[8].mxu0 }
 0x4cc   :  { %2039 = vmatprep.subr.bf16.mxu1 %v2432_v27  ;;  %v2439_v29 = vpop.f32.mrb[9].mxu0 }
 0x4cd   :  { %1953 = vmatprep.mubr.msk.f32.mxu1 %vm1023_vm10, %v2439_v29  ;;  %v2445_v30 = vpack.c.bf16 %v2436_v28, %v2439_v29 }
 0x4ce   :  { %1954 = vmatmul.mubr.msk.f32.gmra.mrb[14].mxu1 %vm1023_vm10, %v2436_v28 }
 0x56e   :  { %v2458_v35 = vpop.f32.mrb[10].mxu1 }
 0x56f   :  { %v2460_v36 = vpop.f32.mrb[11].mxu1 }
 0x572   :  { %v2462_v37 = vpop.f32.mrb[10].mxu0 }
 0x573   :  { %v2464_v38 = vpop.f32.mrb[11].mxu0 }
 0x59d   :  { %v1952_v39 = vpop.f32.mrb[12].mxu1 }
 0x59e   :  { %v1102_v40 = vpop.f32.mrb[13].mxu1 }
 0x59f   :  { %2109 = vtanh.f32 %v1102_v40 }
 0x5a0   :  { %2111 = vtanh.f32 %v1952_v39 }
 0x5a1   :  { %v1955_v41 = vpop.f32.mrb[14].mxu1 }
 0x5a2   :  { %v1112_v42 = vpop.f32.mrb[15].mxu1 }
 0x5a3   :  { %2113 = vtanh.f32 %v1112_v42 }
 0x5a4   :  { %2115 = vtanh.f32 %v1955_v41 }
 0x5a9   :  { %v2110_v45 = vpop.eup %2109 }
 0x5aa   :  { %v2112_v47 = vpop.eup %2111  ;;  %1958 = vmatprep.mubr.msk.f32.mxu0 %vm1023_vm10, %v2110_v45 }
 0x5ab   :  { %1959 = vmatmul.mubr.msk.f32.vlgmr.msra.gmra.mrb[12].mxu0 %vm1023_vm10, %v2112_v47 }
 0x5ac   :  { %2033 = vmatpush3.bf16.msra.mxu0 %v2030_v34 }
 0x5ad   :  { %v2114_v48 = vpop.eup %2113  ;;  %2035 = vmatprep.subr.bf16.mxu0 %v2034_v46 }
 0x5ae   :  { %v2116_v49 = vpop.eup %2115  ;;  %1961 = vmatprep.mubr.msk.f32.mxu0 %vm1023_vm10, %v2114_v48 }
 0x5af   :  { %1962 = vmatmul.mubr.msk.f32.gmra.mrb[14].mxu0 %vm1023_vm10, %v2116_v49 }
 0x5b0   :  { %2037 = vmatpush3.bf16.msra.mxu0 %v2034_v46 }
 0x5b1   :  { %2043 = vmatprep.subr.bf16.mxu0 %v2445_v30 }
 0x67e   :  { %v1960_v51 = vpop.f32.mrb[12].mxu0 }
 0x67f   :  { %v1204_v52 = vpop.f32.mrb[13].mxu0  ;;  %v1210_v54 = vadd.f32 1e-06, %v1960_v51 }
 0x680   :  { %v1205_v57 = vadd.f32 1e-06, %v1204_v52 }
 0x682   :  { %v1963_v53 = vpop.f32.mrb[14].mxu0 }
 0x683   :  { %v1220_v55 = vadd.f32 1e-06, %v1963_v53  ;;  %v1214_v56 = vpop.f32.mrb[15].mxu0 }
 0x684   :  { %v1215_v58 = vadd.f32 1e-06, %v1214_v56 }
 0x685   :  { %v1224_v59 = vmax.f32 %v1210_v54, %v1220_v55 }
 0x686   :  { %v1223_v60 = vmax.f32 %v1205_v57, %v1215_v58 }
 0x687   :  { %v1226_v61 = vsub.f32 %v1210_v54, %v1224_v59  ;;  %v1232_v62 = vsub.f32 %v1220_v55, %v1224_v59 }
 0x688   :  { %v1225_v63 = vsub.f32 %v1205_v57, %v1223_v60  ;;  %v1231_v0 = vsub.f32 %v1215_v58, %v1223_v60 }
 0x689   :  { %v1229_v1 = vmul.f32 1.442695, %v1226_v61  ;;  %v1235_v2 = vmul.f32 1.442695, %v1232_v62 }
 0x68a   :  { %v1227_v3 = vmul.f32 1.442695, %v1225_v63  ;;  %v1233_v4 = vmul.f32 1.442695, %v1231_v0 }
 0x68b   :  { %2117 = vpow2.f32 %v1229_v1 }
 0x68c   :  { %2119 = vpow2.f32 %v1235_v2 }
 0x68d   :  { %2121 = vpow2.f32 %v1227_v3  ;;  %v1799_v3 = vld [vmem:[%s2579_s20] ss:$0 sm:$0xff]  ;;  %s2153_s20 = smov 113  }
 0x68e   :  { %2123 = vpow2.f32 %v1233_v4 }
 0x695   :  { %v2118_v5 = vpop.eup %2117 }
 0x696   :  { %v2120_v6 = vpop.eup %2119 }
 0x697   :  { %v2122_v7 = vpop.eup %2121  ;;  %v1238_v8 = vadd.f32 %v2120_v6, %v2118_v5 }
 0x698   :  { %v2124_v9 = vpop.eup %2123 }
 0x699   :  { %v1237_v10 = vadd.f32 %v2124_v9, %v2122_v7  ;;  %2125 = vrcp.f32 %v1238_v8 }
 0x69b   :  { %2127 = vrcp.f32 %v1237_v10 }
 0x6a3   :  { %v2126_v11 = vpop.eup %2125 }
 0x6a4   :  { %v2477_v12 = vmul.f32 %v2126_v11, %v2118_v5  ;;  %v2479_v13 = vmul.f32 %v2126_v11, %v2120_v6 }
 0x6a5   :  { %v2128_v14 = vpop.eup %2127 }
 0x6a6   :  { %1252 = vperm.xlu1 %2060, %v2477_v12   ;;  %v2482_v15 = vmul.f32 %v2128_v14, %v2122_v7  ;;  %v2484_v16 = vmul.f32 %v2128_v14, %v2124_v9 }
 0x6a8   :  { %1247 = vperm.xlu0 %2059, %v2482_v15  }
 0x6aa   :  { %1259 = vperm.xlu1 %2060, %v2484_v16  }
 0x6ae   :  { %1264 = vperm.xlu1 %2060, %v2479_v13  }
 0x6c7   :  { %1551 = vadd.xlane.f32.xlu0 %v1550_v18 }
 0x6d2   :  { %1548 = vadd.xlane.f32.xlu1 %v1547_v20 }
 0x6d6   :  { %1643 = vadd.xlane.f32.xlu1 %v1642_v22 }
 0x6da   :  { %1646 = vadd.xlane.f32.xlu1 %v1645_v24 }
 0x6dd   :  { %1656 = vrot.lane.b32.xlu0 %v2436_v28, %s2145_s5 }
 0x6e1   :  { %1680 = vrot.lane.b32.xlu0 %v2458_v35, %s2146_s27 }
 0x6e5   :  { %1688 = vrot.lane.b32.xlu0 %v2462_v37, %s2147_s0 }
 0x6eb   :  { %1654 = vrot.lane.b32.xlu1 %v2439_v29, %s2145_s5 }
 0x6ef   :  { %1678 = vrot.lane.b32.xlu1 %v2460_v36, %s2146_s27 }
 0x6f3   :  { %1686 = vrot.lane.b32.xlu1 %v2464_v38, %s2147_s0 }
 0x725   :  { %v1253_v31 = vpop.permute.xlu1 %1252 }
 0x726   :  { %v1256_v35 = vmul.f32 %v2424_v25, %v1253_v31 }
 0x727   :  { %v1248_v32 = vpop.permute.xlu0 %1247 }
 0x728   :  { %v1255_v34 = vmul.f32 %v1248_v32, %v2426_v26 }
 0x729   :  { %v1260_v33 = vpop.permute.xlu1 %1259 }
 0x72a   :  { %v1267_v39 = vmul.f32 %v1260_v33, %v2439_v29 }
 0x72c   :  { %v1269_v40 = vadd.f32 %v1267_v39, %v1255_v34 }
 0x72d   :  { %v1265_v41 = vpop.permute.xlu1 %1264 }
 0x72e   :  { %v1268_v42 = vmul.f32 %v2436_v28, %v1265_v41  ;;  %1692 = vrot.lane.b32.xlu1 %v1269_v40, %s2148_s6  ;;  %1966 = vmatprep.mubr.msk.f32.mxu1 %vm1023_vm10, %v1269_v40  ;;  %v1794_v28 = vld [vmem:[%s2578_s18] ss:$0 sm:$0xff] }
 0x730   :  { %v1270_v36 = vadd.f32 %v1268_v42, %v1256_v35 }
 0x732   :  { %1694 = vrot.lane.b32.xlu0 %v1270_v36, %s2148_s6  ;;  %1967 = vmatmul.mubr.msk.f32.vlgmr.msra.gmra.mrb[16].mxu1 %vm1023_vm10, %v1270_v36 }
 0x733   :  { %2041 = vmatpush3.bf16.msra.mxu1 %v2432_v27  ;;  %1984 = vmatprep.mubr.msk.f32.mxu1 %vm255_vm3, %v1464_v19 }
 0x736   :  { %1985 = vmatmul.mubr.msk.f32.vlgmr.msra.gmra.mrb[18].mxu1 %vm255_vm3, %v1465_v17 }
 0x754   :  { %v1552_v29 = vpop.xlane.xlu0 %1551 }
 0x755   :  { %v1554_v37 = vmax.f32 %v1552_v29, 1.0 }
 0x757   :  { %2129 = vrcp.f32 %v1554_v37 }
 0x758   :  { %v1657_v19 = vpop.permute.xlu0 %1656 }
 0x75f   :  { %v1549_v38 = vpop.xlane.xlu1 %1548 }
 0x760   :  { %v1553_v43 = vmax.f32 %v1549_v38, 1.0 }
 0x761   :  { %v2130_v47 = vpop.eup %2129 }
 0x762   :  { %2131 = vrcp.f32 %v1553_v43 }
 0x763   :  { %v1644_v63 = vpop.xlane.xlu1 %1643 }
 0x764   :  { %v1648_v2 = vmax.f32 %v1644_v63, 1.0 }
 0x767   :  { %v1647_v0 = vpop.xlane.xlu1 %1646 }
 0x768   :  { %v1649_v1 = vmax.f32 %v1647_v0, 1.0 }
 0x76b   :  { %v1655_v17 = vpop.permute.xlu1 %1654 }
 0x76c   :  { %v2132_v49 = vpop.eup %2131 }
 0x76f   :  { %v1679_v18 = vpop.permute.xlu1 %1678 }
 0x773   :  { %v1687_v20 = vpop.permute.xlu1 %1686 }
 0x7a0   :  { %v1693_v22 = vpop.permute.xlu1 %1692 }
 0x805   :  { %v1968_v44 = vpop.f32.mrb[16].mxu1 }
 0x806   :  { %v1357_v45 = vadd.f32 %v1968_v44, %v1794_v28  ;;  %v1351_v46 = vpop.f32.mrb[17].mxu1 }
 0x807   :  { %v1352_v48 = vadd.f32 %v1794_v28, %v1351_v46 }
 0x808   :  { %v1363_v27 = vmin.f32 %v1357_v45, 0.0  ;;  %vm1361_vm12 = vcmp.gt.f32.partialorder %v1357_v45, 0.0 }
 0x809   :  { %v1362_v50 = vmin.f32 %v1352_v48, 0.0  ;;  %v1986_v51 = vpop.f32.mrb[18].mxu1  ;;  %vm1360_vm11 = vcmp.gt.f32.partialorder %v1352_v48, 0.0 }
 0x80a   :  { %v1366_v52 = vmul.f32 1.442695, %v1363_v27  ;;  %v1558_v53 = vmul.f32 %v2130_v47, %v1986_v51  ;;  %v1538_v54 = vpop.f32.mrb[19].mxu1 }
 0x80b   :  { %v1364_v55 = vmul.f32 1.442695, %v1362_v50  ;;  %v1557_v56 = vmul.f32 %v2132_v49, %v1538_v54 }
 0x80c   :  { %2133 = vpow2.f32 %v1366_v52  ;;  %1664 = vrot.lane.b32.xlu1 %v1558_v53, %s2149_s10 }
 0x80d   :  { %2135 = vpow2.f32 %v1364_v55 }
 0x80e   :  { %2137 = vrcp.f32 %v1649_v1 }
 0x80f   :  { %2139 = vrcp.f32 %v1648_v2 }
 0x810   :  { %1662 = vrot.lane.b32.xlu1 %v1557_v56, %s2149_s10 }
 0x816   :  { %v2134_v57 = vpop.eup %2133 }
 0x817   :  { %v2136_v58 = vpop.eup %2135  ;;  %v1798_v59 = vadd.f32 -1.0, %v2134_v57 }
 0x818   :  { %v1797_v60 = vadd.f32 -1.0, %v2136_v58 }
 0x819   :  { %v1371_v62 = vsel %vm1361_vm12, %v1357_v45, %v1798_v59 }
 0x81a   :  { %v1370_v61 = vsel %vm1360_vm11, %v1352_v48, %v1797_v60 }
 0x81b   :  { %1977 = vmatprep.mubr.msk.f32.mxu0 %vm78_vm1, %v1370_v61 }
 0x81c   :  { %1978 = vmatmul.mubr.msk.f32.vlgmr.msra.gmra.mrb[16].mxu0 %vm78_vm1, %v1371_v62 }
 0x81d   :  { %2045 = vmatpush3.bf16.msra.mxu0 %v2445_v30  ;;  %1991 = vmatprep.mubr.msk.f32.mxu0 %vm255_vm3, %v2500_v21  ;;  %v2138_v30 = vpop.eup %2137  ;;  %v1681_v21 = vpop.permute.xlu0 %1680 }
 0x81e   :  { %v2140_v9 = vpop.eup %2139 }
 0x820   :  { %1992 = vmatmul.mubr.msk.f32.vlgmr.msra.gmra.mrb[18].mxu0 %vm255_vm3, %v2507_v23 }
 0x821   :  { %v1689_v24 = vpop.permute.xlu0 %1688 }
 0x825   :  { %v1695_v31 = vpop.permute.xlu0 %1694 }
 0x87e   :  { %v1665_v23 = vpop.permute.xlu1 %1664 }
 0x882   :  { %v1663_v32 = vpop.permute.xlu1 %1662 }
 0x8ef   :  { %v1979_v4 = vpop.f32.mrb[16].mxu0 }
 0x8f0   :  { %v1461_v5 = vadd.f32 %v1979_v4, %v1799_v3  ;;  %v1455_v6 = vpop.f32.mrb[17].mxu0 }
 0x8f1   :  { %v1456_v7 = vadd.f32 %v1799_v3, %v1455_v6 }
 0x8f2   :  { %1702 = vrot.lane.b32.xlu0 %v1461_v5, %s2150_s12 }
 0x8f3   :  { %v1993_v8 = vpop.f32.mrb[18].mxu0  ;;  %1700 = vrot.lane.b32.xlu1 %v1456_v7, %s2150_s12 }
 0x8f4   :  { %v1653_v10 = vmul.f32 %v2138_v30, %v1993_v8  ;;  %v1633_v11 = vpop.f32.mrb[19].mxu0 }
 0x8f5   :  { %v1652_v14 = vmul.f32 %v2140_v9, %v1633_v11 }
 0x8f6   :  { %1672 = vrot.lane.b32.xlu0 %v1653_v10, %s2151_s13 }
 0x8f7   :  { %1670 = vrot.lane.b32.xlu1 %v1652_v14, %s2151_s13 }
 0x8fa   :  { %1708 = vrot.lane.b32.xlu0 %v2477_v12, %s2152_s15  ;;  %v1719_v12 = vsel %vm1023_vm10, %v2424_v25, %v1657_v19 }
 0x8fb   :  { %1706 = vrot.lane.b32.xlu1 %v2482_v15, %s2152_s15  ;;  %v1721_v15 = vsel %vm255_vm3, %v1719_v12, %v1665_v23 }
 0x8fe   :  { %1714 = vrot.lane.b32.xlu0 %v2479_v13, %s2153_s20  ;;  %v1718_v13 = vsel %vm1023_vm10, %v2426_v26, %v1655_v17 }
 0x8ff   :  { %1712 = vrot.lane.b32.xlu1 %v2484_v16, %s2153_s20  ;;  %v1720_v39 = vsel %vm255_vm3, %v1718_v13, %v1663_v32  ;;  %vm1738_vm3 = vcmask 924672  }
 0x964   :  { %v1703_v33 = vpop.permute.xlu0 %1702 }
 0x965   :  { %v1701_v34 = vpop.permute.xlu1 %1700 }
 0x968   :  { %v1673_v16 = vpop.permute.xlu0 %1672 }
 0x969   :  { %v1723_v40 = vsel %vm163_vm0, %v1721_v15, %v1673_v16  ;;  %v1671_v41 = vpop.permute.xlu1 %1670 }
 0x96a   :  { %v1725_v35 = vsel %vm78_vm1, %v1723_v40, %v1681_v21  ;;  %v1722_v42 = vsel %vm163_vm0, %v1720_v39, %v1671_v41 }
 0x96b   :  { %v1728_v36 = vsel %vm1726_vm13, %v1725_v35, %v1689_v24  ;;  %v1724_v25 = vsel %vm78_vm1, %v1722_v42, %v1679_v18 }
 0x96c   :  { %v1727_v29 = vsel %vm1726_vm13, %v1724_v25, %v1687_v20  ;;  %v1731_v26 = vsel %vm1729_vm14, %v1728_v36, %v1695_v31  ;;  %v1709_v37 = vpop.permute.xlu0 %1708 }
 0x96d   :  { %v1734_v38 = vsel %vm1732_vm15, %v1731_v26, %v1703_v33  ;;  %v1730_v43 = vsel %vm1729_vm14, %v1727_v29, %v1693_v22  ;;  %v1707_v28 = vpop.permute.xlu1 %1706 }
 0x96e   :  { %v1733_v44 = vsel %vm1732_vm15, %v1730_v43, %v1701_v34  ;;  %v1737_v45 = vsel %vm1735_vm2, %v1734_v38, %v1709_v37 }
 0x96f   :  { %v1736_v47 = vsel %vm1735_vm2, %v1733_v44, %v1707_v28 }
 0x970   :  { %v1715_v46 = vpop.permute.xlu0 %1714 }
 0x971   :  { %v1740_v48 = vsel %vm1738_vm3, %v1737_v45, %v1715_v46  ;;  %v1713_v27 = vpop.permute.xlu1 %1712 }
 0x972   :  { %v1743_v49 = vsel %vm1741_vm4, %v1740_v48, 0.0  ;;  %v1739_v50 = vsel %vm1738_vm3, %v1736_v47, %v1713_v27 }
 0x973   :  { %1745 = vst [vmem:[%s2580_s21 + $0x8] sm:$0xff] %v1743_v49  ;;  %v1742_v51 = vsel %vm1741_vm4, %v1739_v50, 0.0 }
 0x974   :  { %1744 = vst [vmem:[%s2580_s21] sm:$0xff] %v1742_v51 }

</bundles_post_ra>
